<compile_context>
chip_gen: v5e
topology: v5e:2x2
jax: 0.10.0
libtpu: 0.0.40
codegen_flags: <defaults>
</compile_context>

<pallas_src>
import jax
import jax.numpy as jnp
from jax import lax
from jax.experimental import pallas as pl
from jax.experimental.pallas import tpu as pltpu


def make_gat_kernel(depth, heads, head_dim, num_classes):
    hc = heads * head_dim

    def kernel(x_ref, mask_ref, wcat_ref, asrc_ref, nrm_ref, onehot_ref, wfc_ref, out_ref):
        n = x_ref.shape[0]
        mask_stack = mask_ref[...]                                     # (H*N, N) additive mask, f32
        head_row = [nrm_ref[hh:hh + 1, :] for hh in range(heads)]      # hoisted 0/1 lane masks (1, HC)
        h_bf = x_ref[...]                                              # (N, 128) bf16, zero-padded feats

        for l in range(depth):
            # features + all per-head dst logits from ONE lane-dense bf16 matmul (f32 accum)
            z = jnp.dot(h_bf, wcat_ref[l], preferred_element_type=jnp.float32)        # (N, HC+H)
            # per-head src logits: depends only on h_bf -> parallel MXU issue, off the z chain
            s_hn = lax.dot_general(asrc_ref[l], h_bf, (((1,), (1,)), ((), ())),
                                   preferred_element_type=jnp.float32)                # (H, N)
            hl_bf = z[:, :hc].astype(jnp.bfloat16)                                     # (N, HC)
            d = z[:, hc:hc + heads]                                                    # (N, H)

            # scores for ALL heads stacked along sublanes: row h*N+i (target i, head h), col j (source)
            e = jnp.concatenate(
                [d[:, hh:hh + 1] + s_hn[hh:hh + 1, :] for hh in range(heads)], axis=0)  # (H*N, N)
            e = jnp.where(e >= 0.0, e, 0.2 * e) + mask_stack        # LeakyReLU(0.2) + additive -1e30 mask
            m = jnp.max(e, axis=-1, keepdims=True)                  # one batched softmax over sources
            p = jnp.exp(e - m)
            inv = pl.reciprocal(jnp.sum(p, axis=-1, keepdims=True), approx=True)       # EUP
            alpha_bf = (p * inv).astype(jnp.bfloat16)               # (H*N, N)

            # aggregation for all heads in ONE matmul
            o_stack = jnp.dot(alpha_bf, hl_bf, preferred_element_type=jnp.float32)     # (H*N, HC)

            # reconstruct the lane-dense head concat: head hh's 32-lane block comes from its
            # 16-row block of o_stack; add the post-concat bias (precomputed f32 row).
            h = nrm_ref[heads + l:heads + l + 1, :]                                    # (1, HC) bias
            for hh in range(heads):
                h = h + o_stack[hh * n:(hh + 1) * n, :] * head_row[hh]
            h_bf = h.astype(jnp.bfloat16)

        # fused epilogue: global_add_pool (one-hot matmul) + final Linear
        pooled = jnp.dot(onehot_ref[...], h_bf, preferred_element_type=jnp.float32)    # (G, HC)
        out_ref[...] = (jnp.dot(pooled.astype(jnp.bfloat16), wfc_ref[...],
                                preferred_element_type=jnp.float32)
                        + nrm_ref[heads + depth:heads + depth + 1, 0:num_classes])

    return kernel


def pack_gat_params(x, mask_bias, batch, raw_params, w_fc, b_fc, *, heads, head_dim, num_graphs):
    """Host-side folding/packing: 7 VMEM inputs instead of 17 (fewer tiny DMAs)."""
    depth = len(raw_params)
    hc = heads * head_dim
    n, f = x.shape
    fin_pad = hc                                   # pad every layer's Fin to H*C (=128 here)
    num_classes = w_fc.shape[1]

    x_pad = jnp.zeros((n, fin_pad), jnp.float32).at[:, :f].set(x).astype(jnp.bfloat16)
    mask_stack = jnp.tile(mask_bias, (heads, 1))   # (H*N, N) additive mask, replicated per head

    eye_h = jnp.eye(heads, dtype=jnp.float32)
    wcat_list, asrc_list, bias_rows = [], [], []
    for (w, att_src, att_dst, bias) in raw_params:
        fin = w.shape[0]
        w_pad = jnp.zeros((fin_pad, hc), jnp.float32).at[:fin, :].set(w)
        # block-diagonal dst projection: a_dst_mat[h*C+c, h'] = att_dst[h,c] * (h==h')
        a_dst_mat = (att_dst[:, :, None] * eye_h[:, None, :]).reshape(hc, heads)
        wcat_list.append(jnp.concatenate([w_pad, w_pad @ a_dst_mat], axis=1).astype(jnp.bfloat16))
        # folded src projection: asrcT[h, :] = W[:, h*C:(h+1)*C] @ att_src[h]
        asrcT = jnp.einsum("fhc,hc->hf", w_pad.reshape(fin_pad, heads, head_dim), att_src)
        asrc_list.append(asrcT.astype(jnp.bfloat16))
        bias_rows.append(bias.reshape(1, hc))

    wcat_all = jnp.stack(wcat_list)                # (depth, fin_pad, HC+H) bf16
    asrc_all = jnp.stack(asrc_list)                # (depth, H, fin_pad)  bf16

    # single f32 slab: rows 0:H = per-head 0/1 lane masks, rows H:H+depth = layer biases,
    # last row cols 0:K = fc bias
    lane = jnp.arange(hc)
    head_rows = (lane[None, :] // head_dim == jnp.arange(heads)[:, None]).astype(jnp.float32)
    fc_row = jnp.zeros((1, hc), jnp.float32).at[0, :num_classes].set(b_fc)
    nrm = jnp.concatenate([head_rows, jnp.concatenate(bias_rows, axis=0), fc_row], axis=0)

    onehot_bf = jax.nn.one_hot(batch, num_graphs, dtype=jnp.float32).T.astype(jnp.bfloat16)  # (G, N)
    wfc_bf = w_fc.astype(jnp.bfloat16)                                                       # (HC, K)
    return x_pad, mask_stack, wcat_all, asrc_all, nrm, onehot_bf, wfc_bf


def gat_model_forward(x_pad, mask_stack, wcat_all, asrc_all, nrm, onehot_bf, wfc_bf,
                      *, depth, heads, head_dim, n_nodes, num_graphs, num_classes):
    inputs = (x_pad, mask_stack, wcat_all, asrc_all, nrm, onehot_bf, wfc_bf)
    vmem = pl.BlockSpec(memory_space=pltpu.MemorySpace.VMEM)
    hc = heads * head_dim
    n, hds = n_nodes, heads
    flops = (2 * depth * (n * hc * (hc + hds) + hds * hc * n + hds * n * n * hc)
             + 2 * (num_graphs * n * hc + num_graphs * hc * num_classes))
    transcendentals = depth * (hds * n * n + hds * n)
    bytes_accessed = (sum(int(a.size) * a.dtype.itemsize for a in inputs)
                      + num_graphs * num_classes * 4)
    return pl.pallas_call(
        make_gat_kernel(depth, heads, head_dim, num_classes),
        out_shape=jax.ShapeDtypeStruct((num_graphs, num_classes), jnp.float32),
        in_specs=[vmem] * len(inputs),
        out_specs=vmem,
        cost_estimate=pl.CostEstimate(flops=flops, transcendentals=transcendentals,
                                      bytes_accessed=bytes_accessed),
    )(*inputs)


def gat_reference(x, adj, batch, raw_params, w_fc, b_fc, *, heads, head_dim, num_graphs):
    """Pure-JAX f32 reference with the same dense-attention semantics (PyG GATConv)."""
    h = x
    for (w, att_src, att_dst, bias) in raw_params:
        hl = h @ w
        n = hl.shape[0]
        hh3 = hl.reshape(n, heads, head_dim)
        d = jnp.einsum("nhc,hc->nh", hh3, att_dst)
        s = jnp.einsum("nhc,hc->nh", hh3, att_src)
        outs = []
        for k in range(heads):
            e = d[:, k][:, None] + s[:, k][None, :]
            e = jnp.where(e >= 0.0, e, 0.2 * e)
            e = jnp.where(adj > 0.0, e, -1e30)
            alpha = jax.nn.softmax(e, axis=-1)
            outs.append(alpha @ hh3[:, k, :])
        h = jnp.concatenate(outs, axis=-1) + bias[None, :]
    onehot_t = jax.nn.one_hot(batch, num_graphs, dtype=jnp.float32).T
    return onehot_t @ h @ w_fc + b_fc[None, :]


if __name__ == "__main__":
    key = jax.random.PRNGKey(0)

    # Model hyperparameters (GATModel with small per-head dim so heads*head_dim = 128 lanes)
    num_features = 8
    head_dim = 32
    heads = 4
    depth = 3
    num_classes = 1
    hc = heads * head_dim

    # Graph batch: 2 graphs of 8 nodes each
    N, G = 16, 2

    key, k = jax.random.split(key)
    x = jax.random.normal(k, (N, num_features), dtype=jnp.float32)
    batch = jnp.concatenate([jnp.zeros(N // 2, jnp.int32), jnp.ones(N // 2, jnp.int32)])

    # deterministic edge_index: bidirectional ring within each graph
    src, dst = [], []
    for g in range(G):
        base, n_g = g * (N // G), N // G
        for i in range(n_g):
            s, t = base + i, base + (i + 1) % n_g
            src += [s, t]
            dst += [t, s]
    edge_index = jnp.array([src, dst], dtype=jnp.int32)

    # dense adjacency adj[target, source] with self-loops (PyG add_self_loops=True),
    # turned into an additive softmax mask once (0 on edges, -1e30 elsewhere)
    adj = jnp.zeros((N, N), jnp.float32).at[edge_index[1], edge_index[0]].set(1.0)
    adj = jnp.minimum(adj + jnp.eye(N, dtype=jnp.float32), 1.0)
    mask_bias = jnp.where(adj > 0.0, 0.0, -1e30).astype(jnp.float32)

    # Deterministic parameter init (shapes per GATConv / Linear)
    dims_in = [num_features] + [hc] * (depth - 1)
    raw_params = []
    for fin in dims_in:
        key, k1, k2, k3, k4 = jax.random.split(key, 5)
        raw_params.append((
            0.1 * jax.random.normal(k1, (fin, hc), jnp.float32),           # lin weight (Fin, H*C)
            0.1 * jax.random.normal(k2, (heads, head_dim), jnp.float32),   # att_src
            0.1 * jax.random.normal(k3, (heads, head_dim), jnp.float32),   # att_dst
            0.1 * jax.random.normal(k4, (hc,), jnp.float32),               # post-concat bias
        ))
    key, k1, k2 = jax.random.split(key, 3)
    w_fc = 0.1 * jax.random.normal(k1, (hc, num_classes), jnp.float32)
    b_fc = 0.1 * jax.random.normal(k2, (num_classes,), jnp.float32)

    packed = pack_gat_params(x, mask_bias, batch, raw_params, w_fc, b_fc,
                             heads=heads, head_dim=head_dim, num_graphs=G)
    out = gat_model_forward(*packed, depth=depth, heads=heads, head_dim=head_dim,
                            n_nodes=N, num_graphs=G, num_classes=num_classes)
    out = jax.block_until_ready(out)

    ref = gat_reference(x, adj, batch, raw_params, w_fc, b_fc,
                        heads=heads, head_dim=head_dim, num_graphs=G)

    assert out.shape == (G, num_classes)
    assert bool(jnp.all(jnp.isfinite(out)))
    # bf16 MXU operands (f32 accumulation) vs f32 reference -> slightly looser tolerance
    assert jnp.allclose(out, ref, rtol=5e-2, atol=3e-2)
    print("KERNEL_OK")
</pallas_src>

<mosaic_0001>
module attributes {stable_mosaic.version = 11 : i64} {
  func.func @kernel(%arg0: memref<16x128xbf16, #tpu.memory_space<vmem>>, %arg1: memref<64x16xf32, #tpu.memory_space<vmem>>, %arg2: memref<3x128x132xbf16, #tpu.memory_space<vmem>>, %arg3: memref<3x4x128xbf16, #tpu.memory_space<vmem>>, %arg4: memref<8x128xf32, #tpu.memory_space<vmem>>, %arg5: memref<2x16xbf16, #tpu.memory_space<vmem>>, %arg6: memref<128x1xbf16, #tpu.memory_space<vmem>>, %arg7: memref<2x1xf32, #tpu.memory_space<vmem>>) attributes {dimension_semantics = [], scalar_prefetch = 0 : i64, scratch_operands = 0 : i64, tpu.core_type = #tpu.core_type<tc>} {
    %c0 = arith.constant 0 : index
    %c0_0 = arith.constant 0 : index
    %0 = vector.load %arg1[%c0, %c0_0] : memref<64x16xf32, #tpu.memory_space<vmem>>, vector<64x16xf32>
    %c0_1 = arith.constant 0 : index
    %c0_2 = arith.constant 0 : index
    %1 = vector.load %arg4[%c0_1, %c0_2] : memref<8x128xf32, #tpu.memory_space<vmem>>, vector<1x128xf32>
    %c1 = arith.constant 1 : index
    %c0_3 = arith.constant 0 : index
    %2 = vector.load %arg4[%c1, %c0_3] : memref<8x128xf32, #tpu.memory_space<vmem>>, vector<1x128xf32>
    %c2 = arith.constant 2 : index
    %c0_4 = arith.constant 0 : index
    %3 = vector.load %arg4[%c2, %c0_4] : memref<8x128xf32, #tpu.memory_space<vmem>>, vector<1x128xf32>
    %c3 = arith.constant 3 : index
    %c0_5 = arith.constant 0 : index
    %4 = vector.load %arg4[%c3, %c0_5] : memref<8x128xf32, #tpu.memory_space<vmem>>, vector<1x128xf32>
    %c0_6 = arith.constant 0 : index
    %c0_7 = arith.constant 0 : index
    %5 = vector.load %arg0[%c0_6, %c0_7] : memref<16x128xbf16, #tpu.memory_space<vmem>>, vector<16x128xbf16>
    %c0_8 = arith.constant 0 : index
    %c0_9 = arith.constant 0 : index
    %c0_10 = arith.constant 0 : index
    %6 = vector.load %arg2[%c0_8, %c0_9, %c0_10] : memref<3x128x132xbf16, #tpu.memory_space<vmem>>, vector<1x128x132xbf16>
    %7 = vector.shape_cast %6 : vector<1x128x132xbf16> to vector<128x132xbf16>
    %cst = arith.constant dense<0.000000e+00> : vector<16x132xf32>
    %8 = tpu.matmul %5, %7, %cst {dimension_numbers = #tpu.dot_dimension_numbers<[1], [0], [0], [1], [0, 0, 1, 1], [], []>} : vector<16x128xbf16>, vector<128x132xbf16>, vector<16x132xf32> -> vector<16x132xf32>
    %c0_11 = arith.constant 0 : index
    %c0_12 = arith.constant 0 : index
    %c0_13 = arith.constant 0 : index
    %9 = vector.load %arg3[%c0_11, %c0_12, %c0_13] : memref<3x4x128xbf16, #tpu.memory_space<vmem>>, vector<1x4x128xbf16>
    %10 = vector.shape_cast %9 : vector<1x4x128xbf16> to vector<4x128xbf16>
    %cst_14 = arith.constant dense<0.000000e+00> : vector<4x16xf32>
    %11 = tpu.matmul %10, %5, %cst_14 {dimension_numbers = #tpu.dot_dimension_numbers<[1], [1], [0], [0], [0, 0, 1, 0], [], []>} : vector<4x128xbf16>, vector<16x128xbf16>, vector<4x16xf32> -> vector<4x16xf32>
    %12 = vector.extract_strided_slice %8 {offsets = [0, 0], sizes = [16, 128], strides = [1, 1]} : vector<16x132xf32> to vector<16x128xf32>
    %13 = arith.truncf %12 : vector<16x128xf32> to vector<16x128xbf16>
    %14 = vector.extract_strided_slice %8 {offsets = [0, 128], sizes = [16, 4], strides = [1, 1]} : vector<16x132xf32> to vector<16x4xf32>
    %15 = vector.extract_strided_slice %14 {offsets = [0, 0], sizes = [16, 1], strides = [1, 1]} : vector<16x4xf32> to vector<16x1xf32>
    %16 = vector.extract_strided_slice %11 {offsets = [0, 0], sizes = [1, 16], strides = [1, 1]} : vector<4x16xf32> to vector<1x16xf32>
    %17 = vector.broadcast %15 : vector<16x1xf32> to vector<16x16xf32>
    %18 = vector.broadcast %16 : vector<1x16xf32> to vector<16x16xf32>
    %19 = arith.addf %17, %18 : vector<16x16xf32>
    %20 = vector.extract_strided_slice %14 {offsets = [0, 1], sizes = [16, 1], strides = [1, 1]} : vector<16x4xf32> to vector<16x1xf32>
    %21 = vector.extract_strided_slice %11 {offsets = [1, 0], sizes = [1, 16], strides = [1, 1]} : vector<4x16xf32> to vector<1x16xf32>
    %22 = vector.broadcast %20 : vector<16x1xf32> to vector<16x16xf32>
    %23 = vector.broadcast %21 : vector<1x16xf32> to vector<16x16xf32>
    %24 = arith.addf %22, %23 : vector<16x16xf32>
    %25 = vector.extract_strided_slice %14 {offsets = [0, 2], sizes = [16, 1], strides = [1, 1]} : vector<16x4xf32> to vector<16x1xf32>
    %26 = vector.extract_strided_slice %11 {offsets = [2, 0], sizes = [1, 16], strides = [1, 1]} : vector<4x16xf32> to vector<1x16xf32>
    %27 = vector.broadcast %25 : vector<16x1xf32> to vector<16x16xf32>
    %28 = vector.broadcast %26 : vector<1x16xf32> to vector<16x16xf32>
    %29 = arith.addf %27, %28 : vector<16x16xf32>
    %30 = vector.extract_strided_slice %14 {offsets = [0, 3], sizes = [16, 1], strides = [1, 1]} : vector<16x4xf32> to vector<16x1xf32>
    %31 = vector.extract_strided_slice %11 {offsets = [3, 0], sizes = [1, 16], strides = [1, 1]} : vector<4x16xf32> to vector<1x16xf32>
    %32 = vector.broadcast %30 : vector<16x1xf32> to vector<16x16xf32>
    %33 = vector.broadcast %31 : vector<1x16xf32> to vector<16x16xf32>
    %34 = arith.addf %32, %33 : vector<16x16xf32>
    %35 = tpu.concatenate %19, %24, %29, %34 in 0 : vector<16x16xf32>, vector<16x16xf32>, vector<16x16xf32>, vector<16x16xf32> -> vector<64x16xf32>
    %cst_15 = arith.constant 0.000000e+00 : f32
    %36 = vector.broadcast %cst_15 : f32 to vector<64x16xf32>
    %37 = arith.cmpf oge, %35, %36 : vector<64x16xf32>
    %cst_16 = arith.constant 2.000000e-01 : f32
    %38 = vector.broadcast %cst_16 : f32 to vector<64x16xf32>
    %39 = arith.mulf %38, %35 : vector<64x16xf32>
    %40 = arith.select %37, %35, %39 : vector<64x16xi1>, vector<64x16xf32>
    %41 = arith.addf %40, %0 : vector<64x16xf32>
    %cst_17 = arith.constant dense<0xFF800000> : vector<64xf32>
    %42 = vector.multi_reduction <maximumf>, %41, %cst_17 [1] : vector<64x16xf32> to vector<64xf32>
    %43 = vector.shape_cast %42 : vector<64xf32> to vector<64x1xf32>
    %44 = vector.broadcast %43 : vector<64x1xf32> to vector<64x16xf32>
    %45 = arith.subf %41, %44 : vector<64x16xf32>
    %46 = math.exp %45 : vector<64x16xf32>
    %cst_18 = arith.constant dense<0.000000e+00> : vector<64xf32>
    %47 = vector.multi_reduction <add>, %46, %cst_18 [1] : vector<64x16xf32> to vector<64xf32>
    %48 = vector.shape_cast %47 : vector<64xf32> to vector<64x1xf32>
    %49 = tpu.reciprocal %48 {approx = true} : vector<64x1xf32> -> vector<64x1xf32>
    %50 = vector.broadcast %49 : vector<64x1xf32> to vector<64x16xf32>
    %51 = arith.mulf %46, %50 : vector<64x16xf32>
    %52 = arith.truncf %51 : vector<64x16xf32> to vector<64x16xbf16>
    %cst_19 = arith.constant dense<0.000000e+00> : vector<64x128xf32>
    %53 = tpu.matmul %52, %13, %cst_19 {dimension_numbers = #tpu.dot_dimension_numbers<[1], [0], [0], [1], [0, 0, 1, 1], [], []>} : vector<64x16xbf16>, vector<16x128xbf16>, vector<64x128xf32> -> vector<64x128xf32>
    %c4 = arith.constant 4 : index
    %c0_20 = arith.constant 0 : index
    %54 = vector.load %arg4[%c4, %c0_20] : memref<8x128xf32, #tpu.memory_space<vmem>>, vector<1x128xf32>
    %55 = vector.extract_strided_slice %53 {offsets = [0, 0], sizes = [16, 128], strides = [1, 1]} : vector<64x128xf32> to vector<16x128xf32>
    %56 = vector.broadcast %1 : vector<1x128xf32> to vector<16x128xf32>
    %57 = arith.mulf %55, %56 : vector<16x128xf32>
    %58 = vector.broadcast %54 : vector<1x128xf32> to vector<16x128xf32>
    %59 = arith.addf %58, %57 : vector<16x128xf32>
    %60 = vector.extract_strided_slice %53 {offsets = [16, 0], sizes = [16, 128], strides = [1, 1]} : vector<64x128xf32> to vector<16x128xf32>
    %61 = vector.broadcast %2 : vector<1x128xf32> to vector<16x128xf32>
    %62 = arith.mulf %60, %61 : vector<16x128xf32>
    %63 = arith.addf %59, %62 : vector<16x128xf32>
    %64 = vector.extract_strided_slice %53 {offsets = [32, 0], sizes = [16, 128], strides = [1, 1]} : vector<64x128xf32> to vector<16x128xf32>
    %65 = vector.broadcast %3 : vector<1x128xf32> to vector<16x128xf32>
    %66 = arith.mulf %64, %65 : vector<16x128xf32>
    %67 = arith.addf %63, %66 : vector<16x128xf32>
    %68 = vector.extract_strided_slice %53 {offsets = [48, 0], sizes = [16, 128], strides = [1, 1]} : vector<64x128xf32> to vector<16x128xf32>
    %69 = vector.broadcast %4 : vector<1x128xf32> to vector<16x128xf32>
    %70 = arith.mulf %68, %69 : vector<16x128xf32>
    %71 = arith.addf %67, %70 : vector<16x128xf32>
    %72 = arith.truncf %71 : vector<16x128xf32> to vector<16x128xbf16>
    %c1_21 = arith.constant 1 : index
    %c0_22 = arith.constant 0 : index
    %c0_23 = arith.constant 0 : index
    %73 = vector.load %arg2[%c1_21, %c0_22, %c0_23] : memref<3x128x132xbf16, #tpu.memory_space<vmem>>, vector<1x128x132xbf16>
    %74 = vector.shape_cast %73 : vector<1x128x132xbf16> to vector<128x132xbf16>
    %cst_24 = arith.constant dense<0.000000e+00> : vector<16x132xf32>
    %75 = tpu.matmul %72, %74, %cst_24 {dimension_numbers = #tpu.dot_dimension_numbers<[1], [0], [0], [1], [0, 0, 1, 1], [], []>} : vector<16x128xbf16>, vector<128x132xbf16>, vector<16x132xf32> -> vector<16x132xf32>
    %c1_25 = arith.constant 1 : index
    %c0_26 = arith.constant 0 : index
    %c0_27 = arith.constant 0 : index
    %76 = vector.load %arg3[%c1_25, %c0_26, %c0_27] : memref<3x4x128xbf16, #tpu.memory_space<vmem>>, vector<1x4x128xbf16>
    %77 = vector.shape_cast %76 : vector<1x4x128xbf16> to vector<4x128xbf16>
    %cst_28 = arith.constant dense<0.000000e+00> : vector<4x16xf32>
    %78 = tpu.matmul %77, %72, %cst_28 {dimension_numbers = #tpu.dot_dimension_numbers<[1], [1], [0], [0], [0, 0, 1, 0], [], []>} : vector<4x128xbf16>, vector<16x128xbf16>, vector<4x16xf32> -> vector<4x16xf32>
    %79 = vector.extract_strided_slice %75 {offsets = [0, 0], sizes = [16, 128], strides = [1, 1]} : vector<16x132xf32> to vector<16x128xf32>
    %80 = arith.truncf %79 : vector<16x128xf32> to vector<16x128xbf16>
    %81 = vector.extract_strided_slice %75 {offsets = [0, 128], sizes = [16, 4], strides = [1, 1]} : vector<16x132xf32> to vector<16x4xf32>
    %82 = vector.extract_strided_slice %81 {offsets = [0, 0], sizes = [16, 1], strides = [1, 1]} : vector<16x4xf32> to vector<16x1xf32>
    %83 = vector.extract_strided_slice %78 {offsets = [0, 0], sizes = [1, 16], strides = [1, 1]} : vector<4x16xf32> to vector<1x16xf32>
    %84 = vector.broadcast %82 : vector<16x1xf32> to vector<16x16xf32>
    %85 = vector.broadcast %83 : vector<1x16xf32> to vector<16x16xf32>
    %86 = arith.addf %84, %85 : vector<16x16xf32>
    %87 = vector.extract_strided_slice %81 {offsets = [0, 1], sizes = [16, 1], strides = [1, 1]} : vector<16x4xf32> to vector<16x1xf32>
    %88 = vector.extract_strided_slice %78 {offsets = [1, 0], sizes = [1, 16], strides = [1, 1]} : vector<4x16xf32> to vector<1x16xf32>
    %89 = vector.broadcast %87 : vector<16x1xf32> to vector<16x16xf32>
    %90 = vector.broadcast %88 : vector<1x16xf32> to vector<16x16xf32>
    %91 = arith.addf %89, %90 : vector<16x16xf32>
    %92 = vector.extract_strided_slice %81 {offsets = [0, 2], sizes = [16, 1], strides = [1, 1]} : vector<16x4xf32> to vector<16x1xf32>
    %93 = vector.extract_strided_slice %78 {offsets = [2, 0], sizes = [1, 16], strides = [1, 1]} : vector<4x16xf32> to vector<1x16xf32>
    %94 = vector.broadcast %92 : vector<16x1xf32> to vector<16x16xf32>
    %95 = vector.broadcast %93 : vector<1x16xf32> to vector<16x16xf32>
    %96 = arith.addf %94, %95 : vector<16x16xf32>
    %97 = vector.extract_strided_slice %81 {offsets = [0, 3], sizes = [16, 1], strides = [1, 1]} : vector<16x4xf32> to vector<16x1xf32>
    %98 = vector.extract_strided_slice %78 {offsets = [3, 0], sizes = [1, 16], strides = [1, 1]} : vector<4x16xf32> to vector<1x16xf32>
    %99 = vector.broadcast %97 : vector<16x1xf32> to vector<16x16xf32>
    %100 = vector.broadcast %98 : vector<1x16xf32> to vector<16x16xf32>
    %101 = arith.addf %99, %100 : vector<16x16xf32>
    %102 = tpu.concatenate %86, %91, %96, %101 in 0 : vector<16x16xf32>, vector<16x16xf32>, vector<16x16xf32>, vector<16x16xf32> -> vector<64x16xf32>
    %cst_29 = arith.constant 0.000000e+00 : f32
    %103 = vector.broadcast %cst_29 : f32 to vector<64x16xf32>
    %104 = arith.cmpf oge, %102, %103 : vector<64x16xf32>
    %cst_30 = arith.constant 2.000000e-01 : f32
    %105 = vector.broadcast %cst_30 : f32 to vector<64x16xf32>
    %106 = arith.mulf %105, %102 : vector<64x16xf32>
    %107 = arith.select %104, %102, %106 : vector<64x16xi1>, vector<64x16xf32>
    %108 = arith.addf %107, %0 : vector<64x16xf32>
    %cst_31 = arith.constant dense<0xFF800000> : vector<64xf32>
    %109 = vector.multi_reduction <maximumf>, %108, %cst_31 [1] : vector<64x16xf32> to vector<64xf32>
    %110 = vector.shape_cast %109 : vector<64xf32> to vector<64x1xf32>
    %111 = vector.broadcast %110 : vector<64x1xf32> to vector<64x16xf32>
    %112 = arith.subf %108, %111 : vector<64x16xf32>
    %113 = math.exp %112 : vector<64x16xf32>
    %cst_32 = arith.constant dense<0.000000e+00> : vector<64xf32>
    %114 = vector.multi_reduction <add>, %113, %cst_32 [1] : vector<64x16xf32> to vector<64xf32>
    %115 = vector.shape_cast %114 : vector<64xf32> to vector<64x1xf32>
    %116 = tpu.reciprocal %115 {approx = true} : vector<64x1xf32> -> vector<64x1xf32>
    %117 = vector.broadcast %116 : vector<64x1xf32> to vector<64x16xf32>
    %118 = arith.mulf %113, %117 : vector<64x16xf32>
    %119 = arith.truncf %118 : vector<64x16xf32> to vector<64x16xbf16>
    %cst_33 = arith.constant dense<0.000000e+00> : vector<64x128xf32>
    %120 = tpu.matmul %119, %80, %cst_33 {dimension_numbers = #tpu.dot_dimension_numbers<[1], [0], [0], [1], [0, 0, 1, 1], [], []>} : vector<64x16xbf16>, vector<16x128xbf16>, vector<64x128xf32> -> vector<64x128xf32>
    %c5 = arith.constant 5 : index
    %c0_34 = arith.constant 0 : index
    %121 = vector.load %arg4[%c5, %c0_34] : memref<8x128xf32, #tpu.memory_space<vmem>>, vector<1x128xf32>
    %122 = vector.extract_strided_slice %120 {offsets = [0, 0], sizes = [16, 128], strides = [1, 1]} : vector<64x128xf32> to vector<16x128xf32>
    %123 = vector.broadcast %1 : vector<1x128xf32> to vector<16x128xf32>
    %124 = arith.mulf %122, %123 : vector<16x128xf32>
    %125 = vector.broadcast %121 : vector<1x128xf32> to vector<16x128xf32>
    %126 = arith.addf %125, %124 : vector<16x128xf32>
    %127 = vector.extract_strided_slice %120 {offsets = [16, 0], sizes = [16, 128], strides = [1, 1]} : vector<64x128xf32> to vector<16x128xf32>
    %128 = vector.broadcast %2 : vector<1x128xf32> to vector<16x128xf32>
    %129 = arith.mulf %127, %128 : vector<16x128xf32>
    %130 = arith.addf %126, %129 : vector<16x128xf32>
    %131 = vector.extract_strided_slice %120 {offsets = [32, 0], sizes = [16, 128], strides = [1, 1]} : vector<64x128xf32> to vector<16x128xf32>
    %132 = vector.broadcast %3 : vector<1x128xf32> to vector<16x128xf32>
    %133 = arith.mulf %131, %132 : vector<16x128xf32>
    %134 = arith.addf %130, %133 : vector<16x128xf32>
    %135 = vector.extract_strided_slice %120 {offsets = [48, 0], sizes = [16, 128], strides = [1, 1]} : vector<64x128xf32> to vector<16x128xf32>
    %136 = vector.broadcast %4 : vector<1x128xf32> to vector<16x128xf32>
    %137 = arith.mulf %135, %136 : vector<16x128xf32>
    %138 = arith.addf %134, %137 : vector<16x128xf32>
    %139 = arith.truncf %138 : vector<16x128xf32> to vector<16x128xbf16>
    %c2_35 = arith.constant 2 : index
    %c0_36 = arith.constant 0 : index
    %c0_37 = arith.constant 0 : index
    %140 = vector.load %arg2[%c2_35, %c0_36, %c0_37] : memref<3x128x132xbf16, #tpu.memory_space<vmem>>, vector<1x128x132xbf16>
    %141 = vector.shape_cast %140 : vector<1x128x132xbf16> to vector<128x132xbf16>
    %cst_38 = arith.constant dense<0.000000e+00> : vector<16x132xf32>
    %142 = tpu.matmul %139, %141, %cst_38 {dimension_numbers = #tpu.dot_dimension_numbers<[1], [0], [0], [1], [0, 0, 1, 1], [], []>} : vector<16x128xbf16>, vector<128x132xbf16>, vector<16x132xf32> -> vector<16x132xf32>
    %c2_39 = arith.constant 2 : index
    %c0_40 = arith.constant 0 : index
    %c0_41 = arith.constant 0 : index
    %143 = vector.load %arg3[%c2_39, %c0_40, %c0_41] : memref<3x4x128xbf16, #tpu.memory_space<vmem>>, vector<1x4x128xbf16>
    %144 = vector.shape_cast %143 : vector<1x4x128xbf16> to vector<4x128xbf16>
    %cst_42 = arith.constant dense<0.000000e+00> : vector<4x16xf32>
    %145 = tpu.matmul %144, %139, %cst_42 {dimension_numbers = #tpu.dot_dimension_numbers<[1], [1], [0], [0], [0, 0, 1, 0], [], []>} : vector<4x128xbf16>, vector<16x128xbf16>, vector<4x16xf32> -> vector<4x16xf32>
    %146 = vector.extract_strided_slice %142 {offsets = [0, 0], sizes = [16, 128], strides = [1, 1]} : vector<16x132xf32> to vector<16x128xf32>
    %147 = arith.truncf %146 : vector<16x128xf32> to vector<16x128xbf16>
    %148 = vector.extract_strided_slice %142 {offsets = [0, 128], sizes = [16, 4], strides = [1, 1]} : vector<16x132xf32> to vector<16x4xf32>
    %149 = vector.extract_strided_slice %148 {offsets = [0, 0], sizes = [16, 1], strides = [1, 1]} : vector<16x4xf32> to vector<16x1xf32>
    %150 = vector.extract_strided_slice %145 {offsets = [0, 0], sizes = [1, 16], strides = [1, 1]} : vector<4x16xf32> to vector<1x16xf32>
    %151 = vector.broadcast %149 : vector<16x1xf32> to vector<16x16xf32>
    %152 = vector.broadcast %150 : vector<1x16xf32> to vector<16x16xf32>
    %153 = arith.addf %151, %152 : vector<16x16xf32>
    %154 = vector.extract_strided_slice %148 {offsets = [0, 1], sizes = [16, 1], strides = [1, 1]} : vector<16x4xf32> to vector<16x1xf32>
    %155 = vector.extract_strided_slice %145 {offsets = [1, 0], sizes = [1, 16], strides = [1, 1]} : vector<4x16xf32> to vector<1x16xf32>
    %156 = vector.broadcast %154 : vector<16x1xf32> to vector<16x16xf32>
    %157 = vector.broadcast %155 : vector<1x16xf32> to vector<16x16xf32>
    %158 = arith.addf %156, %157 : vector<16x16xf32>
    %159 = vector.extract_strided_slice %148 {offsets = [0, 2], sizes = [16, 1], strides = [1, 1]} : vector<16x4xf32> to vector<16x1xf32>
    %160 = vector.extract_strided_slice %145 {offsets = [2, 0], sizes = [1, 16], strides = [1, 1]} : vector<4x16xf32> to vector<1x16xf32>
    %161 = vector.broadcast %159 : vector<16x1xf32> to vector<16x16xf32>
    %162 = vector.broadcast %160 : vector<1x16xf32> to vector<16x16xf32>
    %163 = arith.addf %161, %162 : vector<16x16xf32>
    %164 = vector.extract_strided_slice %148 {offsets = [0, 3], sizes = [16, 1], strides = [1, 1]} : vector<16x4xf32> to vector<16x1xf32>
    %165 = vector.extract_strided_slice %145 {offsets = [3, 0], sizes = [1, 16], strides = [1, 1]} : vector<4x16xf32> to vector<1x16xf32>
    %166 = vector.broadcast %164 : vector<16x1xf32> to vector<16x16xf32>
    %167 = vector.broadcast %165 : vector<1x16xf32> to vector<16x16xf32>
    %168 = arith.addf %166, %167 : vector<16x16xf32>
    %169 = tpu.concatenate %153, %158, %163, %168 in 0 : vector<16x16xf32>, vector<16x16xf32>, vector<16x16xf32>, vector<16x16xf32> -> vector<64x16xf32>
    %cst_43 = arith.constant 0.000000e+00 : f32
    %170 = vector.broadcast %cst_43 : f32 to vector<64x16xf32>
    %171 = arith.cmpf oge, %169, %170 : vector<64x16xf32>
    %cst_44 = arith.constant 2.000000e-01 : f32
    %172 = vector.broadcast %cst_44 : f32 to vector<64x16xf32>
    %173 = arith.mulf %172, %169 : vector<64x16xf32>
    %174 = arith.select %171, %169, %173 : vector<64x16xi1>, vector<64x16xf32>
    %175 = arith.addf %174, %0 : vector<64x16xf32>
    %cst_45 = arith.constant dense<0xFF800000> : vector<64xf32>
    %176 = vector.multi_reduction <maximumf>, %175, %cst_45 [1] : vector<64x16xf32> to vector<64xf32>
    %177 = vector.shape_cast %176 : vector<64xf32> to vector<64x1xf32>
    %178 = vector.broadcast %177 : vector<64x1xf32> to vector<64x16xf32>
    %179 = arith.subf %175, %178 : vector<64x16xf32>
    %180 = math.exp %179 : vector<64x16xf32>
    %cst_46 = arith.constant dense<0.000000e+00> : vector<64xf32>
    %181 = vector.multi_reduction <add>, %180, %cst_46 [1] : vector<64x16xf32> to vector<64xf32>
    %182 = vector.shape_cast %181 : vector<64xf32> to vector<64x1xf32>
    %183 = tpu.reciprocal %182 {approx = true} : vector<64x1xf32> -> vector<64x1xf32>
    %184 = vector.broadcast %183 : vector<64x1xf32> to vector<64x16xf32>
    %185 = arith.mulf %180, %184 : vector<64x16xf32>
    %186 = arith.truncf %185 : vector<64x16xf32> to vector<64x16xbf16>
    %cst_47 = arith.constant dense<0.000000e+00> : vector<64x128xf32>
    %187 = tpu.matmul %186, %147, %cst_47 {dimension_numbers = #tpu.dot_dimension_numbers<[1], [0], [0], [1], [0, 0, 1, 1], [], []>} : vector<64x16xbf16>, vector<16x128xbf16>, vector<64x128xf32> -> vector<64x128xf32>
    %c6 = arith.constant 6 : index
    %c0_48 = arith.constant 0 : index
    %188 = vector.load %arg4[%c6, %c0_48] : memref<8x128xf32, #tpu.memory_space<vmem>>, vector<1x128xf32>
    %189 = vector.extract_strided_slice %187 {offsets = [0, 0], sizes = [16, 128], strides = [1, 1]} : vector<64x128xf32> to vector<16x128xf32>
    %190 = vector.broadcast %1 : vector<1x128xf32> to vector<16x128xf32>
    %191 = arith.mulf %189, %190 : vector<16x128xf32>
    %192 = vector.broadcast %188 : vector<1x128xf32> to vector<16x128xf32>
    %193 = arith.addf %192, %191 : vector<16x128xf32>
    %194 = vector.extract_strided_slice %187 {offsets = [16, 0], sizes = [16, 128], strides = [1, 1]} : vector<64x128xf32> to vector<16x128xf32>
    %195 = vector.broadcast %2 : vector<1x128xf32> to vector<16x128xf32>
    %196 = arith.mulf %194, %195 : vector<16x128xf32>
    %197 = arith.addf %193, %196 : vector<16x128xf32>
    %198 = vector.extract_strided_slice %187 {offsets = [32, 0], sizes = [16, 128], strides = [1, 1]} : vector<64x128xf32> to vector<16x128xf32>
    %199 = vector.broadcast %3 : vector<1x128xf32> to vector<16x128xf32>
    %200 = arith.mulf %198, %199 : vector<16x128xf32>
    %201 = arith.addf %197, %200 : vector<16x128xf32>
    %202 = vector.extract_strided_slice %187 {offsets = [48, 0], sizes = [16, 128], strides = [1, 1]} : vector<64x128xf32> to vector<16x128xf32>
    %203 = vector.broadcast %4 : vector<1x128xf32> to vector<16x128xf32>
    %204 = arith.mulf %202, %203 : vector<16x128xf32>
    %205 = arith.addf %201, %204 : vector<16x128xf32>
    %206 = arith.truncf %205 : vector<16x128xf32> to vector<16x128xbf16>
    %c0_49 = arith.constant 0 : index
    %c0_50 = arith.constant 0 : index
    %207 = vector.load %arg5[%c0_49, %c0_50] : memref<2x16xbf16, #tpu.memory_space<vmem>>, vector<2x16xbf16>
    %cst_51 = arith.constant dense<0.000000e+00> : vector<2x128xf32>
    %208 = tpu.matmul %207, %206, %cst_51 {dimension_numbers = #tpu.dot_dimension_numbers<[1], [0], [0], [1], [0, 0, 1, 1], [], []>} : vector<2x16xbf16>, vector<16x128xbf16>, vector<2x128xf32> -> vector<2x128xf32>
    %209 = arith.truncf %208 : vector<2x128xf32> to vector<2x128xbf16>
    %c0_52 = arith.constant 0 : index
    %c0_53 = arith.constant 0 : index
    %210 = vector.load %arg6[%c0_52, %c0_53] : memref<128x1xbf16, #tpu.memory_space<vmem>>, vector<128x1xbf16>
    %cst_54 = arith.constant dense<0.000000e+00> : vector<2x1xf32>
    %211 = tpu.matmul %209, %210, %cst_54 {dimension_numbers = #tpu.dot_dimension_numbers<[1], [0], [0], [1], [0, 0, 1, 1], [], []>} : vector<2x128xbf16>, vector<128x1xbf16>, vector<2x1xf32> -> vector<2x1xf32>
    %c7 = arith.constant 7 : index
    %c0_55 = arith.constant 0 : index
    %212 = vector.load %arg4[%c7, %c0_55] : memref<8x128xf32, #tpu.memory_space<vmem>>, vector<1x1xf32>
    %213 = vector.broadcast %212 : vector<1x1xf32> to vector<2x1xf32>
    %214 = arith.addf %211, %213 : vector<2x1xf32>
    %c0_56 = arith.constant 0 : index
    %c0_57 = arith.constant 0 : index
    %215 = vector.load %arg7[%c0_56, %c0_57] : memref<2x1xf32, #tpu.memory_space<vmem>>, vector<2x1xf32>
    tpu.vector_store %arg7[%c0_56, %c0_57], %214 {strides = array<i32>} : memref<2x1xf32, #tpu.memory_space<vmem>>, vector<2x1xf32>,
    return
  }
}

</mosaic_0001>

<bundles_post_ra>
// kernel: tpu_custom_call.1
= control target key start
LH: loop header
LB: loop body
LE: loop exit
PB: predicated region body
PF: predicated region fallthrough
CT: control target
= control target key end

     0   :  { %v1737_v9 = vmov 3   ;;  %v1738_v13 = vmov 2   ;;  %v1739_v14 = vmov 0   ;;  %v1740_v33 = vmov 1   ;;  %s2392_s2 = inlined_call_operand.vmem [shape: bf16[3,128,132], index: 2, kind: input, shape index: {}]   ;;  %s2393_s0 = inlined_call_operand.vmem [shape: bf16[16,128], index: 0, kind: input, shape index: {}]   ;;  %s2394_s3 = inlined_call_operand.vmem [shape: bf16[3,4,128], index: 3, kind: input, shape index: {}]   ;;  %s2395_s1 = inlined_call_operand.vmem [shape: f32[64,16], index: 1, kind: input, shape index: {}]   ;;  %s2396_s4 = inlined_call_operand.vmem [shape: f32[8,128], index: 4, kind: input, shape index: {}]   ;;  %s2397_s6 = inlined_call_operand.vmem [shape: bf16[128,1], index: 6, kind: input, shape index: {}]   ;;  %s2398_s5 = inlined_call_operand.vmem [shape: bf16[2,16], index: 5, kind: input, shape index: {}]   ;;  %s2399_s7 = inlined_call_operand.vmem [shape: f32[2,1], index: 7, kind: output, shape index: {}]  }
   0x1   :  { %v1556_v0 = vld [vmem:[%s2392_s2 + $0x74] sm:$0xf]  ;;  %v1330_v1 = vld [vmem:[%s2392_s2 + $0x78] sm:$0xf0]  ;;  %v1554_v2 = vld [vmem:[%s2392_s2 + $0x64] sm:$0xf]  ;;  %1605 = vset.pattern.permute.xlu2 %v1737_v9  ;;  %1603 = vset.pattern.permute.xlu0 %v1738_v13 }
   0x2   :  { %v1333_v3 = vor.u32 %v1556_v0, %v1330_v1  ;;  %v1322_v4 = vld [vmem:[%s2392_s2 + $0x68] sm:$0xf0]  ;;  %v1552_v6 = vld [vmem:[%s2392_s2 + $0x54] sm:$0xf]  ;;  %v1314_v7 = vld [vmem:[%s2392_s2 + $0x58] sm:$0xf0]  ;;  %1604 = vset.pattern.permute.xlu1 %v1739_v14 }
   0x3   :  { %v1325_v5 = vor.u32 %v1554_v2, %v1322_v4  ;;  %v1802_v8 = vld [vmem:[%s2393_s0] sm:$0xff]  ;;  %v1317_v10 = vor.u32 %v1552_v6, %v1314_v7  ;;  %v1306_v12 = vld [vmem:[%s2392_s2 + $0x48] sm:$0xf0]  ;;  %v1548_v17 = vld [vmem:[%s2392_s2 + $0x34] sm:$0xf]  ;;  %vm264_vm2 = vcmask 130048  }
   0x4   :  { %157 = vmatpush.bf16.msra.mxu1 %v1333_v3  ;;  %179 = vmatpush.bf16.xpose.msra.mxu2 %v1802_v8  ;;  %v1550_v11 = vld [vmem:[%s2392_s2 + $0x44] sm:$0xf]  ;;  %v171_v16 = vld [vmem:[%s2394_s3] sm:$0x3]  ;;  %v1298_v18 = vld [vmem:[%s2392_s2 + $0x38] sm:$0xf0] }
   0x5   :  { %v1309_v15 = vor.u32 %v1550_v11, %v1306_v12  ;;  %v1301_v19 = vor.u32 %v1548_v17, %v1298_v18  ;;  %v1546_v20 = vld [vmem:[%s2392_s2 + $0x24] sm:$0xf]  ;;  %v1290_v21 = vld [vmem:[%s2392_s2 + $0x28] sm:$0xf0]  ;;  %v1544_v23 = vld [vmem:[%s2392_s2 + $0x14] sm:$0xf] }
   0x6   :  { %v1293_v22 = vor.u32 %v1546_v20, %v1290_v21  ;;  %v1282_v24 = vld [vmem:[%s2392_s2 + $0x18] sm:$0xf0]  ;;  %v1542_v26 = vld [vmem:[%s2392_s2 + $0x4] sm:$0xf]  ;;  %v1274_v27 = vld [vmem:[%s2392_s2 + $0x8] sm:$0xf0] }
   0x7   :  { %v1285_v25 = vor.u32 %v1544_v23, %v1282_v24  ;;  %v1277_v28 = vor.u32 %v1542_v26, %v1274_v27  ;;  %v1328_v41 = vld [vmem:[%s2392_s2 + $0x70] sm:$0xf]  ;;  %v1557_v42 = vld [vmem:[%s2392_s2 + $0x74] sm:$0xf0]  ;;  %v1320_v43 = vld [vmem:[%s2392_s2 + $0x60] sm:$0xf] }
   0x8   :  { %158 = vmatpush.bf16.msra.mxu1 %v1325_v5  ;;  %v1863_v45 = vld [vmem:[%s2395_s1] sm:$0xff]  ;;  %v1329_v46 = vor.u32 %v1557_v42, %v1328_v41  ;;  %v1555_v47 = vld [vmem:[%s2392_s2 + $0x64] sm:$0xf0]  ;;  %v1312_v55 = vld [vmem:[%s2392_s2 + $0x50] sm:$0xf] }
   0x9   :  { %v1871_v49 = vld [vmem:[%s2395_s1 + $0x20] sm:$0xff]  ;;  %v1321_v52 = vor.u32 %v1555_v47, %v1320_v43  ;;  %v1553_v56 = vld [vmem:[%s2392_s2 + $0x54] sm:$0xf0]  ;;  %v1551_v5 = vld [vmem:[%s2392_s2 + $0x44] sm:$0xf0] }
   0xa   :  { %143 = vmatpush.bf16.msra.mxu0 %v1329_v46  ;;  %v1313_v1 = vor.u32 %v1553_v56, %v1312_v55  ;;  %v1304_v4 = vld [vmem:[%s2392_s2 + $0x40] sm:$0xf]  ;;  %v1899_v7 = vld [vmem:[%s2395_s1 + $0x8] sm:$0xff]  ;;  %v1296_v20 = vld [vmem:[%s2392_s2 + $0x30] sm:$0xf] }
   0xb   :  { %180 = vmatmul.bf16.vlgmr.msra.gmra.mxu2 %v171_v16  ;;  %v1904_v11 = vld [vmem:[%s2395_s1 + $0x28] sm:$0xff]  ;;  %v1305_v16 = vor.u32 %v1551_v5, %v1304_v4  ;;  %v1549_v21 = vld [vmem:[%s2392_s2 + $0x34] sm:$0xf0]  ;;  %v1926_v27 = vld [vmem:[%s2395_s1 + $0x30] sm:$0xff] }
   0xc   :  { %159 = vmatpush.bf16.msra.mxu1 %v1317_v10  ;;  %v1280_v46 = vld [vmem:[%s2392_s2 + $0x10] sm:$0xf]  ;;  %v1545_v47 = vld [vmem:[%s2392_s2 + $0x14] sm:$0xf0] }
   0xd   :  { %v1959_v55 = vld [vmem:[%s2395_s1 + $0x10] sm:$0xff] }
   0xe   :  { %144 = vmatpush.bf16.msra.mxu0 %v1321_v52 }
  0x10   :  { %160 = vmatpush.bf16.msra.mxu1 %v1309_v15 }
  0x12   :  { %145 = vmatpush.bf16.msra.mxu0 %v1313_v1 }
  0x14   :  { %161 = vmatpush.bf16.msra.mxu1 %v1301_v19 }
  0x16   :  { %146 = vmatpush.bf16.msra.mxu0 %v1305_v16 }
  0x18   :  { %162 = vmatpush.bf16.msra.mxu1 %v1293_v22 }
  0x1c   :  { %163 = vmatpush.bf16.msra.mxu1 %v1285_v25 }
  0x20   :  { %164 = vmatpush.bf16.msra.mxu1 %v1277_v28  ;;  %v1297_v28 = vor.u32 %v1549_v21, %v1296_v20 }
  0x22   :  { %147 = vmatpush.bf16.msra.mxu0 %v1297_v28 }
  0x23   :  { %165 = vmatmul.bf16.vlgmr.msra.gmra.mxu1 %v1802_v8 }
  0x8e   :  { %v1842_v29 = vpop.f32.mrf.mxu2 }
  0x8f   :  { %v196_v35 = vperm.slane %v1842_v29, 0  ;;  %v218_v36 = vperm.slane %v1842_v29, 2  ;;  %v229_v50 = vperm.slane %v1842_v29, 3  ;;  %v207_v24 = vperm.slane %v1842_v29, 1  ;;  %v1931_v29 = vld [vmem:[%s2395_s1 + $0x38] sm:$0xff] }
  0x96   :  { %v183_v30 = vpop.f32.mrf.mxu2 }
  0xa0   :  { %v166_v31 = vpop.f32.mrf.mxu1 }
  0xa1   :  { %222 = vperm.xlu2 %1605, %v166_v31   ;;  %188 = vperm.xlu1 %1604, %v166_v31  }
  0xa2   :  { %211 = vperm.xlu0 %1603, %v166_v31  }
  0xa8   :  { %v168_v32 = vpop.f32.mrf.mxu1 }
  0xa9   :  { %226 = vperm.xlu2 %1605, %v168_v32   ;;  %193 = vperm.xlu1 %1604, %v168_v32  }
  0xaa   :  { %215 = vperm.xlu0 %1603, %v168_v32  }
  0xb1   :  { %1607 = vset.pattern.permute.xlu1 %v1740_v33  ;;  %1610 = vset.pattern.permute.xlu2 %v1740_v33 }
  0xb2   :  { %1606 = vset.pattern.permute.xlu0 %v1740_v33  ;;  %204 = vperm.xlu1 %1607, %v168_v32  }
  0xb3   :  { %200 = vperm.xlu0 %1606, %v166_v31  }
  0xba   :  { %1609 = vset.pattern.permute.xlu1 %v1739_v14 }
  0xbb   :  { %1608 = vset.pattern.permute.xlu0 %v1739_v14 }
  0xfb   :  { %v223_v34 = vpop.permute.xlu2 %222 }
  0xfc   :  { %v230_v61 = vadd.f32 %v229_v50, %v223_v34 }
  0xfe   :  { %v246_v12 = vmul.f32 0.2, %v230_v61  ;;  %vm238_vm5 = vcmp.ge.f32.partialorder %v230_v61, 0.0 }
 0x100   :  { %v254_v32 = vsel %vm238_vm5, %v230_v61, %v246_v12 }
 0x103   :  { %v227_v57 = vpop.permute.xlu2 %226 }
 0x104   :  { %v231_v2 = vadd.f32 %v229_v50, %v227_v57  ;;  %v1272_v57 = vld [vmem:[%s2392_s2] sm:$0xf] }
 0x106   :  { %v247_v17 = vmul.f32 0.2, %v231_v2  ;;  %vm239_vm6 = vcmp.ge.f32.partialorder %v231_v2, 0.0 }
 0x108   :  { %v255_v34 = vsel %vm239_vm6, %v231_v2, %v247_v17 }
 0x109   :  { %v263_v41 = vadd.f32 %v255_v34, %v1931_v29 }
 0x113   :  { %v189_v37 = vpop.permute.xlu1 %188 }
 0x114   :  { %v197_v38 = vadd.f32 %v196_v35, %v189_v37  ;;  %v212_v39 = vpop.permute.xlu0 %211 }
 0x115   :  { %v219_v40 = vadd.f32 %v218_v36, %v212_v39  ;;  %v1942_v39 = vld [vmem:[%s2395_s1 + $0x18] sm:$0xff] }
 0x116   :  { %vm232_vm0 = vcmp.ge.f32.partialorder %v197_v38, 0.0  ;;  %v240_v44 = vmul.f32 0.2, %v197_v38 }
 0x117   :  { %vm236_vm1 = vcmp.ge.f32.partialorder %v219_v40, 0.0  ;;  %v244_v48 = vmul.f32 0.2, %v219_v40 }
 0x118   :  { %v248_v51 = vsel %vm232_vm0, %v197_v38, %v240_v44 }
 0x119   :  { %v252_v53 = vsel %vm236_vm1, %v219_v40, %v244_v48  ;;  %v1875_v54 = vadd.f32 %v248_v51, %v1863_v45  ;;  %v262_v40 = vadd.f32 %v254_v32, %v1926_v27  ;;  %v286_v51 = vsel %vm264_vm2, %v263_v41, -inf }
 0x11a   :  { %v1884_v58 = vadd.f32 %v252_v53, %v1871_v49  ;;  %v1281_v53 = vor.u32 %v1545_v47, %v1280_v46 }
 0x11b   :  { %v194_v59 = vpop.permute.xlu1 %193  ;;  %v265_v60 = vsel %vm264_vm2, %v1875_v54, -inf  ;;  %v283_v50 = vsel %vm264_vm2, %v262_v40, -inf }
 0x11c   :  { %v198_v62 = vadd.f32 %v196_v35, %v194_v59  ;;  %v216_v63 = vpop.permute.xlu0 %215  ;;  %v277_v0 = vsel %vm264_vm2, %v1884_v58, -inf  ;;  %266 = vmax.xlane.f32.xlu0 %v265_v60  ;;  %v1288_v35 = vld [vmem:[%s2392_s2 + $0x20] sm:$0xf]  ;;  %v1543_v59 = vld [vmem:[%s2392_s2 + $0x4] sm:$0xf0] }
 0x11d   :  { %v220_v3 = vadd.f32 %v218_v36, %v216_v63  ;;  %278 = vmax.xlane.f32.xlu2 %v277_v0  ;;  %v1547_v36 = vld [vmem:[%s2392_s2 + $0x24] sm:$0xf0]  ;;  %v1273_v61 = vor.u32 %v1543_v59, %v1272_v57 }
 0x11e   :  { %vm233_vm3 = vcmp.ge.f32.partialorder %v198_v62, 0.0  ;;  %v241_v6 = vmul.f32 0.2, %v198_v62  ;;  %v1289_v42 = vor.u32 %v1547_v36, %v1288_v35 }
 0x11f   :  { %vm237_vm4 = vcmp.ge.f32.partialorder %v220_v3, 0.0  ;;  %v245_v10 = vmul.f32 0.2, %v220_v3 }
 0x120   :  { %v249_v15 = vsel %vm233_vm3, %v198_v62, %v241_v6  ;;  %148 = vmatpush.bf16.msra.mxu0 %v1289_v42 }
 0x121   :  { %v1907_v18 = vadd.f32 %v249_v15, %v1899_v7  ;;  %v253_v19 = vsel %vm237_vm4, %v220_v3, %v245_v10 }
 0x122   :  { %v1916_v22 = vadd.f32 %v253_v19, %v1904_v11 }
 0x123   :  { %v268_v23 = vsel %vm264_vm2, %v1907_v18, -inf }
 0x124   :  { %v205_v25 = vpop.permute.xlu1 %204  ;;  %v280_v26 = vsel %vm264_vm2, %v1916_v22, -inf  ;;  %149 = vmatpush.bf16.msra.mxu0 %v1281_v53 }
 0x125   :  { %269 = vmax.xlane.f32.xlu2 %v268_v23  ;;  %v209_v30 = vadd.f32 %v207_v24, %v205_v25  ;;  %281 = vmax.xlane.f32.xlu1 %v280_v26  ;;  %v201_v31 = vpop.permute.xlu0 %200 }
 0x126   :  { %v208_v37 = vadd.f32 %v207_v24, %v201_v31 }
 0x127   :  { %vm235_vm7 = vcmp.ge.f32.partialorder %v209_v30, 0.0  ;;  %v243_v38 = vmul.f32 0.2, %v209_v30 }
 0x128   :  { %v242_v43 = vmul.f32 0.2, %v208_v37  ;;  %vm234_vm8 = vcmp.ge.f32.partialorder %v208_v37, 0.0  ;;  %150 = vmatpush.bf16.msra.mxu0 %v1273_v61 }
 0x129   :  { %v251_v44 = vsel %vm235_vm7, %v209_v30, %v243_v38 }
 0x12a   :  { %v259_v48 = vadd.f32 %v251_v44, %v1942_v39  ;;  %v250_v56 = vsel %vm234_vm8, %v208_v37, %v242_v43 }
 0x12b   :  { %v258_v60 = vadd.f32 %v250_v56, %v1959_v55  ;;  %151 = vmatmul.bf16.vlgmr.msra.gmra.mxu0 %v1802_v8 }
 0x12c   :  { %v274_v52 = vsel %vm264_vm2, %v259_v48, -inf }
 0x12d   :  { %284 = vmax.xlane.f32.xlu2 %v283_v50  ;;  %287 = vmax.xlane.f32.xlu1 %v286_v51  ;;  %v271_v62 = vsel %vm264_vm2, %v258_v60, -inf }
 0x12e   :  { %275 = vmax.xlane.f32.xlu0 %v274_v52 }
 0x135   :  { %272 = vmax.xlane.f32.xlu2 %v271_v62 }
 0x18f   :  { %v267_v63 = vpop.xlane.xlu0 %266 }
 0x190   :  { %v279_v0 = vpop.xlane.xlu2 %278  ;;  %v289_v1 = vsub.f32 %v1875_v54, %v267_v63 }
 0x191   :  { %v293_v2 = vsub.f32 %v1884_v58, %v279_v0 }
 0x192   :  { %v297_v3 = vmul.f32 1.442695, %v289_v1 }
 0x193   :  { %v305_v4 = vmul.f32 1.442695, %v293_v2 }
 0x194   :  { %1629 = vpow2.f32 %v297_v3 }
 0x195   :  { %1631 = vpow2.f32 %v305_v4 }
 0x198   :  { %v270_v5 = vpop.xlane.xlu2 %269  ;;  %v282_v6 = vpop.xlane.xlu1 %281 }
 0x199   :  { %v290_v10 = vsub.f32 %v1907_v18, %v270_v5  ;;  %v294_v12 = vsub.f32 %v1916_v22, %v282_v6 }
 0x19a   :  { %v1630_v15 = vpop.eup %1629 }
 0x19b   :  { %v1974_v16 = vpop.eup %1631  ;;  %v299_v8 = vmul.f32 1.442695, %v290_v10  ;;  %v307_v17 = vmul.f32 1.442695, %v294_v12  ;;  %v313_v19 = vsel %vm264_vm2, %v1630_v15, 0.0 }
 0x19c   :  { %v325_v54 = vsel %vm264_vm2, %v1974_v16, 0.0  ;;  %314 = vadd.xlane.f32.xlu0 %v313_v19 }
 0x19d   :  { %1633 = vpow2.f32 %v299_v8  ;;  %326 = vadd.xlane.f32.xlu1 %v325_v54 }
 0x19e   :  { %1635 = vpow2.f32 %v307_v17 }
 0x1a0   :  { %v285_v58 = vpop.xlane.xlu2 %284  ;;  %v288_v20 = vpop.xlane.xlu1 %287 }
 0x1a1   :  { %v295_v21 = vsub.f32 %v262_v40, %v285_v58  ;;  %v296_v18 = vsub.f32 %v263_v41, %v288_v20  ;;  %v276_v23 = vpop.xlane.xlu0 %275 }
 0x1a2   :  { %v292_v28 = vsub.f32 %v259_v48, %v276_v23  ;;  %v1573_v23 = vld [vmem:[%s2392_s2 + $0xf4] sm:$0xf0] }
 0x1a3   :  { %v1634_v22 = vpop.eup %1633  ;;  %v309_v24 = vmul.f32 1.442695, %v295_v21  ;;  %v311_v25 = vmul.f32 1.442695, %v296_v18  ;;  %v1412_v18 = vld [vmem:[%s2392_s2 + $0xf0] sm:$0xf] }
 0x1a4   :  { %v1636_v26 = vpop.eup %1635  ;;  %v316_v30 = vsel %vm264_vm2, %v1634_v22, 0.0  ;;  %v303_v32 = vmul.f32 1.442695, %v292_v28  ;;  %v1404_v28 = vld [vmem:[%s2392_s2 + $0xe0] sm:$0xf] }
 0x1a5   :  { %1637 = vpow2.f32 %v309_v24  ;;  %317 = vadd.xlane.f32.xlu1 %v316_v30  ;;  %v328_v31 = vsel %vm264_vm2, %v1636_v26, 0.0  ;;  %v1413_v24 = vor.u32 %v1573_v23, %v1412_v18  ;;  %v1571_v30 = vld [vmem:[%s2392_s2 + $0xe4] sm:$0xf0]  ;;  %v2089_v23 = vld [vmem:[%s2396_s4] ss:$0 sm:$0xff] }
 0x1a6   :  { %1639 = vpow2.f32 %v311_v25  ;;  %329 = vadd.xlane.f32.xlu2 %v328_v31  ;;  %v1414_v25 = vld [vmem:[%s2392_s2 + $0xf8] sm:$0xf0]  ;;  %v1570_v31 = vld [vmem:[%s2392_s2 + $0xe4] sm:$0xf] }
 0x1a7   :  { %1641 = vpow2.f32 %v303_v32  ;;  %518 = vmatpush.bf16.msrb.mxu2 %v1413_v24  ;;  %v1405_v32 = vor.u32 %v1571_v30, %v1404_v28 }
 0x1a8   :  { %v273_v34 = vpop.xlane.xlu2 %272  ;;  %v152_v47 = vpop.f32.mrf.mxu0 }
 0x1a9   :  { %v291_v35 = vsub.f32 %v258_v60, %v273_v34  ;;  %v1406_v34 = vld [vmem:[%s2392_s2 + $0xe8] sm:$0xf0] }
 0x1ab   :  { %v1638_v36 = vpop.eup %1637  ;;  %v301_v37 = vmul.f32 1.442695, %v291_v35  ;;  %v1409_v35 = vor.u32 %v1570_v31, %v1406_v34  ;;  %519 = vmatpush.bf16.msrb.mxu2 %v1405_v32  ;;  %v2105_v34 = vld [vmem:[%s2396_s4 + $0x2] ss:$0 sm:$0xff] }
 0x1ac   :  { %v1640_v38 = vpop.eup %1639  ;;  %v331_v40 = vsel %vm264_vm2, %v1638_v36, 0.0 }
 0x1ad   :  { %1643 = vpow2.f32 %v301_v37  ;;  %v334_v41 = vsel %vm264_vm2, %v1640_v38, 0.0  ;;  %v1642_v42 = vpop.eup %1641  ;;  %v1569_v37 = vld [vmem:[%s2392_s2 + $0xd4] sm:$0xf0] }
 0x1ae   :  { %332 = vadd.xlane.f32.xlu2 %v331_v40  ;;  %335 = vadd.xlane.f32.xlu0 %v334_v41  ;;  %v322_v46 = vsel %vm264_vm2, %v1642_v42, 0.0  ;;  %v1398_v41 = vld [vmem:[%s2392_s2 + $0xd8] sm:$0xf0] }
 0x1b0   :  { %v154_v48 = vpop.f32.mrf.mxu0 }
 0x1b1   :  { %v185_v50 = vpack.c.bf16 %v154_v48, %v152_v47  ;;  %v1566_v47 = vld [vmem:[%s2392_s2 + $0xc4] sm:$0xf]  ;;  %v1390_v48 = vld [vmem:[%s2392_s2 + $0xc8] sm:$0xf0] }
 0x1b3   :  { %v1644_v43 = vpop.eup %1643  ;;  %376 = vmatpush.bf16.msrb.mxu0 %v185_v50  ;;  %1598 = vmatpush.bf16.msra.mxu3 %v185_v50  ;;  %v1393_v50 = vor.u32 %v1566_v47, %v1390_v48 }
 0x1b4   :  { %v319_v44 = vsel %vm264_vm2, %v1644_v43, 0.0 }
 0x1b5   :  { %320 = vadd.xlane.f32.xlu1 %v319_v44  ;;  %v1567_v44 = vld [vmem:[%s2392_s2 + $0xc4] sm:$0xf0] }
 0x1b6   :  { %323 = vadd.xlane.f32.xlu2 %v322_v46 }
 0x20f   :  { %v315_v52 = vpop.xlane.xlu0 %314 }
 0x210   :  { %v327_v51 = vpop.xlane.xlu1 %326  ;;  %1645 = vrcp.f32 %v315_v52  ;;  %v1565_v52 = vld [vmem:[%s2392_s2 + $0xb4] sm:$0xf0] }
 0x211   :  { %1647 = vrcp.f32 %v327_v51  ;;  %v1380_v51 = vld [vmem:[%s2392_s2 + $0xb0] sm:$0xf] }
 0x216   :  { %v1646_v57 = vpop.eup %1645 }
 0x217   :  { %v1648_v59 = vpop.eup %1647  ;;  %v345_v62 = vmul.f32 %v1646_v57, %v1630_v15  ;;  %v1382_v57 = vld [vmem:[%s2392_s2 + $0xb8] sm:$0xf0] }
 0x218   :  { %v318_v53 = vpop.xlane.xlu1 %317  ;;  %v349_v1 = vmul.f32 %v1648_v59, %v1974_v16 }
 0x219   :  { %1649 = vrcp.f32 %v318_v53  ;;  %v330_v56 = vpop.xlane.xlu2 %329  ;;  %v1564_v53 = vld [vmem:[%s2392_s2 + $0xb4] sm:$0xf] }
 0x21a   :  { %1651 = vrcp.f32 %v330_v56  ;;  %v1381_v56 = vor.u32 %v1565_v52, %v1380_v51  ;;  %v1385_v59 = vor.u32 %v1564_v53, %v1382_v57  ;;  %v1418_v53 = vld [vmem:[%s2394_s3 + $0x2] sm:$0x3] }
 0x21f   :  { %v1650_v60 = vpop.eup %1649 }
 0x220   :  { %v1652_v61 = vpop.eup %1651  ;;  %v346_v63 = vmul.f32 %v1650_v60, %v1634_v22  ;;  %v1572_v22 = vld [vmem:[%s2392_s2 + $0xf4] sm:$0xf]  ;;  %v1372_v60 = vld [vmem:[%s2392_s2 + $0xa0] sm:$0xf] }
 0x221   :  { %v333_v0 = vpop.xlane.xlu2 %332  ;;  %v350_v2 = vmul.f32 %v1652_v61, %v1636_v26  ;;  %v336_v4 = vpop.xlane.xlu0 %335  ;;  %v1417_v26 = vor.u32 %v1572_v22, %v1414_v25  ;;  %v1563_v61 = vld [vmem:[%s2392_s2 + $0xa4] sm:$0xf0]  ;;  %v2094_v22 = vld [vmem:[%s2396_s4 + $0x1] ss:$0 sm:$0xff]  ;;  %v1622_v25 = vld [vmem:[%s2396_s4 + $0x4] ss:$0 sm:$0xff] }
 0x222   :  { %v353_v3 = vpack.c.bf16 %v346_v63, %v345_v62  ;;  %1653 = vrcp.f32 %v333_v0  ;;  %v1562_v62 = vld [vmem:[%s2392_s2 + $0xa4] sm:$0xf]  ;;  %v1373_v63 = vor.u32 %v1563_v61, %v1372_v60  ;;  %v1374_v0 = vld [vmem:[%s2392_s2 + $0xa8] sm:$0xf0] }
 0x223   :  { %v355_v5 = vpack.c.bf16 %v350_v2, %v349_v1  ;;  %1655 = vrcp.f32 %v336_v4  ;;  %532 = vmatpush.bf16.msra.mxu0 %v1417_v26  ;;  %v1377_v1 = vor.u32 %v1562_v62, %v1374_v0  ;;  %v1364_v2 = vld [vmem:[%s2392_s2 + $0x90] sm:$0xf]  ;;  %v1560_v4 = vld [vmem:[%s2392_s2 + $0x94] sm:$0xf] }
 0x224   :  { %1334 = vmatmul.msk.bf16.vlgmr.msrb.gmra.mxu0 %vm264_vm2, %v353_v3  ;;  %v1561_v3 = vld [vmem:[%s2392_s2 + $0x94] sm:$0xf0] }
 0x225   :  { %1336 = vmatmul.msk.bf16.vlgmr.msra.gmra.mxu3 %vm264_vm2, %v355_v5  ;;  %v1365_v5 = vor.u32 %v1561_v3, %v1364_v2 }
 0x227   :  { %533 = vmatpush.bf16.msra.mxu0 %v1409_v35 }
 0x228   :  { %v321_v6 = vpop.xlane.xlu1 %320  ;;  %v1654_v12 = vpop.eup %1653 }
 0x229   :  { %1657 = vrcp.f32 %v321_v6  ;;  %v324_v10 = vpop.xlane.xlu2 %323  ;;  %v1656_v15 = vpop.eup %1655  ;;  %v351_v17 = vmul.f32 %v1654_v12, %v1638_v36  ;;  %v1396_v36 = vld [vmem:[%s2392_s2 + $0xd0] sm:$0xf]  ;;  %v1366_v6 = vld [vmem:[%s2392_s2 + $0x98] sm:$0xf0] }
 0x22a   :  { %1659 = vrcp.f32 %v324_v10  ;;  %v352_v19 = vmul.f32 %v1656_v15, %v1640_v38  ;;  %v1568_v38 = vld [vmem:[%s2392_s2 + $0xd4] sm:$0xf]  ;;  %v1397_v40 = vor.u32 %v1569_v37, %v1396_v36  ;;  %v1369_v10 = vor.u32 %v1560_v4, %v1366_v6  ;;  %v1356_v15 = vld [vmem:[%s2392_s2 + $0x80] sm:$0xf] }
 0x22b   :  { %v2110_v36 = vld [vmem:[%s2396_s4 + $0x3] ss:$0 sm:$0xff] }
 0x22c   :  { %v356_v21 = vpack.c.bf16 %v352_v19, %v351_v17  ;;  %520 = vmatpush.bf16.msrb.mxu2 %v1397_v40  ;;  %v1558_v17 = vld [vmem:[%s2392_s2 + $0x84] sm:$0xf] }
 0x22f   :  { %v1658_v8 = vpop.eup %1657 }
 0x230   :  { %v1660_v16 = vpop.eup %1659  ;;  %v347_v54 = vmul.f32 %v1658_v8, %v1644_v43  ;;  %v1388_v43 = vld [vmem:[%s2392_s2 + $0xc0] sm:$0xf]  ;;  %v1559_v8 = vld [vmem:[%s2392_s2 + $0x84] sm:$0xf0] }
 0x231   :  { %v348_v58 = vmul.f32 %v1660_v16, %v1642_v42  ;;  %v1401_v42 = vor.u32 %v1568_v38, %v1398_v41  ;;  %v1389_v46 = vor.u32 %v1567_v44, %v1388_v43  ;;  %v1357_v19 = vor.u32 %v1559_v8, %v1356_v15  ;;  %v1358_v16 = vld [vmem:[%s2392_s2 + $0x88] sm:$0xf0] }
 0x233   :  { %v354_v20 = vpack.c.bf16 %v348_v58, %v347_v54  ;;  %534 = vmatpush.bf16.msra.mxu0 %v1401_v42  ;;  %521 = vmatpush.bf16.msrb.mxu2 %v1389_v46  ;;  %v1361_v54 = vor.u32 %v1558_v17, %v1358_v16 }
 0x235   :  { %1335 = vmatmul.msk.bf16.gmra.mxu0 %vm264_vm2, %v354_v20  ;;  %1337 = vmatmul.msk.bf16.gmra.mxu3 %vm264_vm2, %v356_v21 }
 0x237   :  { %535 = vmatpush.bf16.msra.mxu0 %v1393_v50  ;;  %522 = vmatpush.bf16.msrb.mxu2 %v1381_v56 }
 0x23b   :  { %536 = vmatpush.bf16.msra.mxu0 %v1385_v59  ;;  %523 = vmatpush.bf16.msrb.mxu2 %v1373_v63 }
 0x23f   :  { %537 = vmatpush.bf16.msra.mxu0 %v1377_v1  ;;  %524 = vmatpush.bf16.msrb.mxu2 %v1365_v5 }
 0x243   :  { %538 = vmatpush.bf16.msra.mxu0 %v1369_v10  ;;  %525 = vmatpush.bf16.msrb.mxu2 %v1357_v19 }
 0x247   :  { %539 = vmatpush.bf16.msra.mxu0 %v1361_v54 }
 0x2a1   :  { %v378_v12 = vpop.f32.mrf.mxu0 }
 0x2a2   :  { %v400_v24 = vmul.f32 %v2089_v23, %v378_v12 }
 0x2a4   :  { %v403_v32 = vadd.f32 %v1622_v25, %v400_v24 }
 0x2a8   :  { %v388_v58 = vpop.f32.mrf.mxu3 }
 0x2a9   :  { %v380_v20 = vpop.f32.mrf.mxu0  ;;  %v411_v41 = vmul.f32 %v2105_v34, %v388_v58 }
 0x2aa   :  { %v401_v26 = vmul.f32 %v2089_v23, %v380_v20 }
 0x2ac   :  { %v404_v35 = vadd.f32 %v1622_v25, %v401_v26 }
 0x2b0   :  { %v390_v21 = vpop.f32.mrf.mxu3 }
 0x2b1   :  { %v412_v42 = vmul.f32 %v2105_v34, %v390_v21 }
 0x2b2   :  { %v383_v18 = vpop.f32.mrf.mxu0 }
 0x2b3   :  { %v406_v30 = vmul.f32 %v2094_v22, %v383_v18 }
 0x2b5   :  { %v408_v38 = vadd.f32 %v406_v30, %v403_v32 }
 0x2b7   :  { %v413_v46 = vadd.f32 %v411_v41, %v408_v38 }
 0x2b8   :  { %v393_v28 = vpop.f32.mrf.mxu3 }
 0x2b9   :  { %v416_v43 = vmul.f32 %v2110_v36, %v393_v28 }
 0x2ba   :  { %v385_v31 = vpop.f32.mrf.mxu0 }
 0x2bb   :  { %v407_v37 = vmul.f32 %v2094_v22, %v385_v31  ;;  %v418_v50 = vadd.f32 %v416_v43, %v413_v46 }
 0x2bd   :  { %v409_v40 = vadd.f32 %v407_v37, %v404_v35 }
 0x2bf   :  { %v414_v47 = vadd.f32 %v412_v42, %v409_v40 }
 0x2c0   :  { %v395_v44 = vpop.f32.mrf.mxu3 }
 0x2c1   :  { %v417_v48 = vmul.f32 %v2110_v36, %v395_v44 }
 0x2c3   :  { %v419_v51 = vadd.f32 %v417_v48, %v414_v47 }
 0x2c5   :  { %v420_v52 = vpack.c.bf16 %v419_v51, %v418_v50 }
 0x2c7   :  { %526 = vmatmul.bf16.vlgmr.msrb.gmra.mxu2 %v420_v52  ;;  %540 = vmatmul.bf16.vlgmr.msra.gmra.mxu0 %v420_v52 }
 0x2c8   :  { %555 = vmatpush.bf16.xpose.msrb.mxu1 %v420_v52 }
 0x2cf   :  { %556 = vmatmul.bf16.vlgmr.msrb.gmra.mxu1 %v1418_v53 }
 0x344   :  { %v541_v56 = vpop.f32.mrf.mxu0 }
 0x345   :  { %576 = vperm.xlu2 %1610, %v541_v56   ;;  %564 = vperm.xlu0 %1608, %v541_v56  }
 0x34a   :  { %v527_v57 = vpop.f32.mrf.mxu2 }
 0x34c   :  { %v543_v59 = vpop.f32.mrf.mxu0  ;;  %v2121_v60 = vpop.f32.mrf.mxu1 }
 0x34d   :  { %1611 = vset.pattern.permute.xlu2 %v1738_v13  ;;  %569 = vperm.xlu1 %1609, %v543_v59   ;;  %v583_v0 = vperm.slane %v2121_v60, 1  ;;  %v572_v6 = vperm.slane %v2121_v60, 0  ;;  %v594_v8 = vperm.slane %v2121_v60, 2 }
 0x34e   :  { %587 = vperm.xlu2 %1611, %v541_v56  }
 0x352   :  { %v529_v61 = vpop.f32.mrf.mxu2 }
 0x353   :  { %v561_v62 = vpack.c.bf16 %v529_v61, %v527_v57 }
 0x354   :  { %v559_v63 = vpop.f32.mrf.mxu1 }
 0x355   :  { %1612 = vset.pattern.permute.xlu1 %v1740_v33  ;;  %751 = vmatpush.bf16.msra.mxu2 %v561_v62 }
 0x356   :  { %580 = vperm.xlu1 %1612, %v543_v59   ;;  %1615 = vset.pattern.permute.xlu2 %v1739_v14 }
 0x35e   :  { %1613 = vset.pattern.permute.xlu1 %v1738_v13 }
 0x35f   :  { %591 = vperm.xlu1 %1613, %v543_v59  }
 0x367   :  { %1614 = vset.pattern.permute.xlu1 %v1737_v9 }
 0x368   :  { %598 = vperm.xlu1 %1614, %v541_v56  }
 0x370   :  { %602 = vperm.xlu1 %1614, %v543_v59  }
 0x378   :  { %1616 = vset.pattern.permute.xlu1 %v1740_v33 }
 0x39f   :  { %v577_v1 = vpop.permute.xlu2 %576 }
 0x3a0   :  { %v584_v2 = vadd.f32 %v583_v0, %v577_v1 }
 0x3a2   :  { %vm610_vm9 = vcmp.ge.f32.partialorder %v584_v2, 0.0  ;;  %v618_v3 = vmul.f32 0.2, %v584_v2 }
 0x3a4   :  { %v626_v4 = vsel %vm610_vm9, %v584_v2, %v618_v3 }
 0x3a5   :  { %v2130_v5 = vadd.f32 %v626_v4, %v1959_v55 }
 0x3a7   :  { %v646_v14 = vsel %vm264_vm2, %v2130_v5, -inf }
 0x3a8   :  { %647 = vmax.xlane.f32.xlu1 %v646_v14  ;;  %v588_v19 = vpop.permute.xlu2 %587 }
 0x3a9   :  { %v595_v58 = vadd.f32 %v594_v8, %v588_v19 }
 0x3ab   :  { %v620_v18 = vmul.f32 0.2, %v595_v58  ;;  %vm612_vm12 = vcmp.ge.f32.partialorder %v595_v58, 0.0 }
 0x3ad   :  { %v628_v30 = vsel %vm612_vm12, %v595_v58, %v620_v18 }
 0x3ae   :  { %v636_v32 = vadd.f32 %v628_v30, %v1871_v49  ;;  %v605_v49 = vperm.slane %v2121_v60, 3 }
 0x3b0   :  { %v652_v38 = vsel %vm264_vm2, %v636_v32, -inf }
 0x3b7   :  { %v565_v10 = vpop.permute.xlu0 %564 }
 0x3b8   :  { %v573_v12 = vadd.f32 %v572_v6, %v565_v10 }
 0x3ba   :  { %vm608_vm10 = vcmp.ge.f32.partialorder %v573_v12, 0.0  ;;  %v616_v15 = vmul.f32 0.2, %v573_v12 }
 0x3bc   :  { %v624_v17 = vsel %vm608_vm10, %v573_v12, %v616_v15  ;;  %vm1260_vm10 = vcmask 1024  }
 0x3bd   :  { %v632_v16 = vadd.f32 %v624_v17, %v1863_v45 }
 0x3bf   :  { %v570_v54 = vpop.permute.xlu1 %569  ;;  %v640_v55 = vsel %vm264_vm2, %v632_v16, -inf }
 0x3c0   :  { %v574_v20 = vadd.f32 %v572_v6, %v570_v54  ;;  %641 = vmax.xlane.f32.xlu2 %v640_v55 }
 0x3c2   :  { %vm609_vm11 = vcmp.ge.f32.partialorder %v574_v20, 0.0  ;;  %v617_v21 = vmul.f32 0.2, %v574_v20 }
 0x3c4   :  { %v625_v24 = vsel %vm609_vm11, %v574_v20, %v617_v21 }
 0x3c5   :  { %v633_v25 = vadd.f32 %v625_v24, %v1899_v7 }
 0x3c7   :  { %v643_v26 = vsel %vm264_vm2, %v633_v25, -inf }
 0x3c8   :  { %644 = vmax.xlane.f32.xlu0 %v643_v26  ;;  %v581_v28 = vpop.permute.xlu1 %580 }
 0x3c9   :  { %v585_v31 = vadd.f32 %v583_v0, %v581_v28 }
 0x3cb   :  { %vm611_vm13 = vcmp.ge.f32.partialorder %v585_v31, 0.0  ;;  %v619_v45 = vmul.f32 0.2, %v585_v31 }
 0x3cd   :  { %v627_v35 = vsel %vm611_vm13, %v585_v31, %v619_v45 }
 0x3ce   :  { %v635_v37 = vadd.f32 %v627_v35, %v1942_v39 }
 0x3d0   :  { %653 = vmax.xlane.f32.xlu0 %v652_v38  ;;  %v649_v40 = vsel %vm264_vm2, %v635_v37, -inf }
 0x3d1   :  { %650 = vmax.xlane.f32.xlu2 %v649_v40  ;;  %v592_v7 = vpop.permute.xlu1 %591 }
 0x3d2   :  { %v596_v41 = vadd.f32 %v594_v8, %v592_v7 }
 0x3d4   :  { %vm613_vm14 = vcmp.ge.f32.partialorder %v596_v41, 0.0  ;;  %v621_v42 = vmul.f32 0.2, %v596_v41 }
 0x3d6   :  { %v629_v43 = vsel %vm613_vm14, %v596_v41, %v621_v42 }
 0x3d7   :  { %v637_v44 = vadd.f32 %v629_v43, %v1904_v11 }
 0x3d9   :  { %v655_v46 = vsel %vm264_vm2, %v637_v44, -inf }
 0x3da   :  { %656 = vmax.xlane.f32.xlu2 %v655_v46  ;;  %v599_v47 = vpop.permute.xlu1 %598 }
 0x3db   :  { %v606_v39 = vadd.f32 %v605_v49, %v599_v47 }
 0x3dd   :  { %vm614_vm15 = vcmp.ge.f32.partialorder %v606_v39, 0.0  ;;  %v622_v48 = vmul.f32 0.2, %v606_v39 }
 0x3df   :  { %v630_v50 = vsel %vm614_vm15, %v606_v39, %v622_v48 }
 0x3e0   :  { %v638_v51 = vadd.f32 %v630_v50, %v1926_v27 }
 0x3e2   :  { %v603_v52 = vpop.permute.xlu1 %602  ;;  %v658_v53 = vsel %vm264_vm2, %v638_v51, -inf }
 0x3e3   :  { %v607_v56 = vadd.f32 %v605_v49, %v603_v52  ;;  %659 = vmax.xlane.f32.xlu0 %v658_v53 }
 0x3e5   :  { %vm615_vm0 = vcmp.ge.f32.partialorder %v607_v56, 0.0  ;;  %v623_v57 = vmul.f32 0.2, %v607_v56 }
 0x3e7   :  { %v631_v11 = vsel %vm615_vm0, %v607_v56, %v623_v57 }
 0x3e8   :  { %v639_v59 = vadd.f32 %v631_v11, %v1931_v29 }
 0x3ea   :  { %v661_v60 = vsel %vm264_vm2, %v639_v59, -inf }
 0x3eb   :  { %662 = vmax.xlane.f32.xlu2 %v661_v60 }
 0x41b   :  { %v648_v61 = vpop.xlane.xlu1 %647 }
 0x41c   :  { %v666_v62 = vsub.f32 %v2130_v5, %v648_v61 }
 0x41e   :  { %v676_v63 = vmul.f32 1.442695, %v666_v62 }
 0x420   :  { %1661 = vpow2.f32 %v676_v63 }
 0x426   :  { %v2152_v0 = vpop.eup %1661 }
 0x427   :  { %v694_v27 = vsel %vm264_vm2, %v2152_v0, 0.0 }
 0x428   :  { %695 = vadd.xlane.f32.xlu2 %v694_v27 }
 0x433   :  { %v642_v1 = vpop.xlane.xlu2 %641 }
 0x434   :  { %v664_v2 = vsub.f32 %v632_v16, %v642_v1 }
 0x436   :  { %v672_v3 = vmul.f32 1.442695, %v664_v2 }
 0x438   :  { %1663 = vpow2.f32 %v672_v3 }
 0x43b   :  { %v645_v4 = vpop.xlane.xlu0 %644 }
 0x43c   :  { %v665_v29 = vsub.f32 %v633_v25, %v645_v4 }
 0x43e   :  { %v1664_v14 = vpop.eup %1663  ;;  %v674_v6 = vmul.f32 1.442695, %v665_v29 }
 0x43f   :  { %v688_v10 = vsel %vm264_vm2, %v1664_v14, 0.0 }
 0x440   :  { %1665 = vpow2.f32 %v674_v6  ;;  %689 = vadd.xlane.f32.xlu0 %v688_v10  ;;  %v1497_v6 = vld [vmem:[%s2392_s2 + $0x170] sm:$0xf]  ;;  %v1589_v10 = vld [vmem:[%s2392_s2 + $0x174] sm:$0xf0] }
 0x443   :  { %v654_v5 = vpop.xlane.xlu0 %653 }
 0x444   :  { %v668_v12 = vsub.f32 %v636_v32, %v654_v5  ;;  %v651_v15 = vpop.xlane.xlu2 %650  ;;  %v1588_v5 = vld [vmem:[%s2392_s2 + $0x174] sm:$0xf] }
 0x445   :  { %v667_v8 = vsub.f32 %v635_v37, %v651_v15  ;;  %v1499_v15 = vld [vmem:[%s2392_s2 + $0x178] sm:$0xf0] }
 0x446   :  { %v1666_v17 = vpop.eup %1665  ;;  %v680_v19 = vmul.f32 1.442695, %v668_v12  ;;  %v1498_v12 = vor.u32 %v1589_v10, %v1497_v6 }
 0x447   :  { %v678_v54 = vmul.f32 1.442695, %v667_v8  ;;  %v691_v55 = vsel %vm264_vm2, %v1666_v17, 0.0 }
 0x448   :  { %1667 = vpow2.f32 %v680_v19  ;;  %692 = vadd.xlane.f32.xlu1 %v691_v55  ;;  %889 = vmatpush.bf16.msrb.mxu3 %v1498_v12  ;;  %v1489_v19 = vld [vmem:[%s2392_s2 + $0x160] sm:$0xf]  ;;  %v1586_v55 = vld [vmem:[%s2392_s2 + $0x164] sm:$0xf] }
 0x449   :  { %1669 = vpow2.f32 %v678_v54  ;;  %v1587_v54 = vld [vmem:[%s2392_s2 + $0x164] sm:$0xf0] }
 0x44d   :  { %v657_v16 = vpop.xlane.xlu2 %656 }
 0x44e   :  { %v1668_v58 = vpop.eup %1667  ;;  %v669_v20 = vsub.f32 %v637_v44, %v657_v16  ;;  %v1490_v16 = vor.u32 %v1587_v54, %v1489_v19 }
 0x44f   :  { %v1670_v21 = vpop.eup %1669  ;;  %v700_v18 = vsel %vm264_vm2, %v1668_v58, 0.0 }
 0x450   :  { %v682_v24 = vmul.f32 1.442695, %v669_v20  ;;  %701 = vadd.xlane.f32.xlu1 %v700_v18  ;;  %v697_v25 = vsel %vm264_vm2, %v1670_v21, 0.0  ;;  %890 = vmatpush.bf16.msrb.mxu3 %v1490_v16  ;;  %v1585_v18 = vld [vmem:[%s2392_s2 + $0x154] sm:$0xf0] }
 0x451   :  { %698 = vadd.xlane.f32.xlu0 %v697_v25 }
 0x452   :  { %1671 = vpow2.f32 %v682_v24  ;;  %v1584_v24 = vld [vmem:[%s2392_s2 + $0x154] sm:$0xf] }
 0x456   :  { %v660_v26 = vpop.xlane.xlu0 %659 }
 0x457   :  { %v670_v28 = vsub.f32 %v638_v51, %v660_v26  ;;  %v1483_v26 = vld [vmem:[%s2392_s2 + $0x158] sm:$0xf0] }
 0x458   :  { %v1672_v30 = vpop.eup %1671 }
 0x459   :  { %v684_v31 = vmul.f32 1.442695, %v670_v28  ;;  %v703_v45 = vsel %vm264_vm2, %v1672_v30, 0.0 }
 0x45a   :  { %704 = vadd.xlane.f32.xlu2 %v703_v45  ;;  %v1583_v45 = vld [vmem:[%s2392_s2 + $0x144] sm:$0xf0] }
 0x45b   :  { %1673 = vpow2.f32 %v684_v31  ;;  %v1473_v31 = vld [vmem:[%s2392_s2 + $0x140] sm:$0xf] }
 0x45e   :  { %v663_v32 = vpop.xlane.xlu2 %662 }
 0x45f   :  { %v671_v35 = vsub.f32 %v639_v59, %v663_v32  ;;  %v1582_v32 = vld [vmem:[%s2392_s2 + $0x144] sm:$0xf] }
 0x461   :  { %v1674_v37 = vpop.eup %1673  ;;  %v686_v38 = vmul.f32 1.442695, %v671_v35  ;;  %v1474_v35 = vor.u32 %v1583_v45, %v1473_v31 }
 0x462   :  { %v706_v40 = vsel %vm264_vm2, %v1674_v37, 0.0 }
 0x463   :  { %1675 = vpow2.f32 %v686_v38  ;;  %707 = vadd.xlane.f32.xlu0 %v706_v40  ;;  %v1465_v40 = vld [vmem:[%s2392_s2 + $0x130] sm:$0xf] }
 0x469   :  { %v1676_v7 = vpop.eup %1675 }
 0x46a   :  { %v709_v41 = vsel %vm264_vm2, %v1676_v7, 0.0 }
 0x46b   :  { %710 = vadd.xlane.f32.xlu1 %v709_v41  ;;  %v1580_v41 = vld [vmem:[%s2392_s2 + $0x134] sm:$0xf] }
 0x49b   :  { %v696_v50 = vpop.xlane.xlu2 %695 }
 0x4b3   :  { %v690_v42 = vpop.xlane.xlu0 %689 }
 0x4b4   :  { %1677 = vrcp.f32 %v690_v42 }
 0x4ba   :  { %v1678_v44 = vpop.eup %1677 }
 0x4bb   :  { %v693_v43 = vpop.xlane.xlu1 %692  ;;  %v720_v49 = vmul.f32 %v1678_v44, %v1664_v14 }
 0x4bc   :  { %1679 = vrcp.f32 %v693_v43  ;;  %v1467_v43 = vld [vmem:[%s2392_s2 + $0x138] sm:$0xf0] }
 0x4c2   :  { %v1680_v46 = vpop.eup %1679 }
 0x4c3   :  { %v721_v47 = vmul.f32 %v1680_v46, %v1666_v17  ;;  %v702_v59 = vpop.xlane.xlu1 %701  ;;  %v1502_v17 = vor.u32 %v1588_v5, %v1499_v15  ;;  %v1470_v46 = vor.u32 %v1580_v41, %v1467_v43 }
 0x4c4   :  { %v699_v48 = vpop.xlane.xlu0 %698 }
 0x4c5   :  { %v728_v39 = vpack.c.bf16 %v721_v47, %v720_v49  ;;  %1681 = vrcp.f32 %v699_v48  ;;  %903 = vmatpush.bf16.msra.mxu1 %v1502_v17  ;;  %v1457_v49 = vld [vmem:[%s2392_s2 + $0x120] sm:$0xf]  ;;  %v1579_v47 = vld [vmem:[%s2392_s2 + $0x124] sm:$0xf0] }
 0x4c6   :  { %1683 = vrcp.f32 %v696_v50  ;;  %v1458_v48 = vor.u32 %v1579_v47, %v1457_v49  ;;  %v1459_v50 = vld [vmem:[%s2392_s2 + $0x128] sm:$0xf0] }
 0x4c7   :  { %1419 = vmatmul.msk.bf16.vlgmr.msra.gmra.mxu2 %vm264_vm2, %v728_v39  ;;  %v1578_v39 = vld [vmem:[%s2392_s2 + $0x124] sm:$0xf] }
 0x4cb   :  { %v1682_v51 = vpop.eup %1681 }
 0x4cc   :  { %v1684_v52 = vpop.eup %1683  ;;  %v723_v53 = vmul.f32 %v1682_v51, %v1670_v21  ;;  %v1481_v21 = vld [vmem:[%s2392_s2 + $0x150] sm:$0xf]  ;;  %v1462_v51 = vor.u32 %v1578_v39, %v1459_v50 }
 0x4cd   :  { %v722_v56 = vmul.f32 %v1684_v52, %v2152_v0  ;;  %v705_v57 = vpop.xlane.xlu2 %704  ;;  %v1482_v25 = vor.u32 %v1585_v18, %v1481_v21  ;;  %v1449_v52 = vld [vmem:[%s2392_s2 + $0x110] sm:$0xf] }
 0x4ce   :  { %1685 = vrcp.f32 %v705_v57 }
 0x4cf   :  { %v729_v11 = vpack.c.bf16 %v723_v53, %v722_v56  ;;  %1687 = vrcp.f32 %v702_v59  ;;  %891 = vmatpush.bf16.msrb.mxu3 %v1482_v25  ;;  %v1577_v53 = vld [vmem:[%s2392_s2 + $0x114] sm:$0xf0]  ;;  %v1576_v56 = vld [vmem:[%s2392_s2 + $0x114] sm:$0xf] }
 0x4d0   :  { %v1450_v57 = vor.u32 %v1577_v53, %v1449_v52 }
 0x4d3   :  { %892 = vmatpush.bf16.msrb.mxu3 %v1474_v35 }
 0x4d4   :  { %v1686_v60 = vpop.eup %1685 }
 0x4d5   :  { %v1688_v61 = vpop.eup %1687  ;;  %v725_v62 = vmul.f32 %v1686_v60, %v1672_v30  ;;  %v1486_v30 = vor.u32 %v1584_v24, %v1483_v26 }
 0x4d6   :  { %v724_v63 = vmul.f32 %v1688_v61, %v1668_v58  ;;  %v708_v2 = vpop.xlane.xlu0 %707  ;;  %v1491_v58 = vld [vmem:[%s2392_s2 + $0x168] sm:$0xf0]  ;;  %v1441_v61 = vld [vmem:[%s2392_s2 + $0x100] sm:$0xf] }
 0x4d7   :  { %1420 = vmatmul.msk.bf16.gmra.mxu2 %vm264_vm2, %v729_v11  ;;  %v1494_v20 = vor.u32 %v1586_v55, %v1491_v58  ;;  %v1451_v11 = vld [vmem:[%s2392_s2 + $0x118] sm:$0xf0] }
 0x4d8   :  { %v730_v1 = vpack.c.bf16 %v725_v62, %v724_v63  ;;  %v1454_v60 = vor.u32 %v1576_v56, %v1451_v11  ;;  %v1575_v62 = vld [vmem:[%s2392_s2 + $0x104] sm:$0xf0]  ;;  %v1574_v63 = vld [vmem:[%s2392_s2 + $0x104] sm:$0xf] }
 0x4d9   :  { %904 = vmatpush.bf16.msra.mxu1 %v1494_v20 }
 0x4dd   :  { %905 = vmatpush.bf16.msra.mxu1 %v1486_v30 }
 0x4de   :  { %v711_v27 = vpop.xlane.xlu1 %710 }
 0x4df   :  { %1689 = vrcp.f32 %v711_v27  ;;  %v1442_v27 = vor.u32 %v1575_v62, %v1441_v61 }
 0x4e0   :  { %1691 = vrcp.f32 %v708_v2 }
 0x4e5   :  { %v1690_v3 = vpop.eup %1689 }
 0x4e6   :  { %v1692_v0 = vpop.eup %1691  ;;  %v727_v4 = vmul.f32 %v1690_v3, %v1676_v7  ;;  %v1581_v7 = vld [vmem:[%s2392_s2 + $0x134] sm:$0xf0] }
 0x4e7   :  { %1421 = vmatmul.msk.bf16.gmra.mxu2 %vm264_vm2, %v730_v1  ;;  %v726_v29 = vmul.f32 %v1692_v0, %v1674_v37  ;;  %v1475_v37 = vld [vmem:[%s2392_s2 + $0x148] sm:$0xf0]  ;;  %v1466_v42 = vor.u32 %v1581_v7, %v1465_v40 }
 0x4e8   :  { %v1478_v38 = vor.u32 %v1582_v32, %v1475_v37  ;;  %v1443_v1 = vld [vmem:[%s2392_s2 + $0x108] sm:$0xf0] }
 0x4e9   :  { %v731_v14 = vpack.c.bf16 %v727_v4, %v726_v29  ;;  %893 = vmatpush.bf16.msrb.mxu3 %v1466_v42  ;;  %v1446_v2 = vor.u32 %v1574_v63, %v1443_v1 }
 0x4ea   :  { %906 = vmatpush.bf16.msra.mxu1 %v1478_v38  ;;  %v1725_v38 = vld [vmem:[%s2395_s1] sm:$0xff] }
 0x4ed   :  { %894 = vmatpush.bf16.msrb.mxu3 %v1458_v48 }
 0x4ee   :  { %907 = vmatpush.bf16.msra.mxu1 %v1470_v46  ;;  %v1726_v46 = vld [vmem:[%s2395_s1 + $0x10] sm:$0xff] }
 0x4f1   :  { %895 = vmatpush.bf16.msrb.mxu3 %v1450_v57  ;;  %v1727_v57 = vld [vmem:[%s2395_s1 + $0x8] sm:$0xff] }
 0x4f2   :  { %908 = vmatpush.bf16.msra.mxu1 %v1462_v51 }
 0x4f5   :  { %896 = vmatpush.bf16.msrb.mxu3 %v1442_v27 }
 0x4f6   :  { %909 = vmatpush.bf16.msra.mxu1 %v1454_v60 }
 0x4f7   :  { %1422 = vmatmul.msk.bf16.gmra.mxu2 %vm264_vm2, %v731_v14  ;;  %v1626_v14 = vld [vmem:[%s2396_s4 + $0x5] ss:$0 sm:$0xff] }
 0x4fa   :  { %910 = vmatpush.bf16.msra.mxu1 %v1446_v2  ;;  %v1728_v2 = vld [vmem:[%s2395_s1 + $0x20] sm:$0xff] }
 0x54a   :  { %v2180_v8 = vpop.f32.mrf.mxu2 }
 0x54b   :  { %v774_v29 = vmul.f32 %v2089_v23, %v2180_v8 }
 0x54d   :  { %v777_v12 = vadd.f32 %v1626_v14, %v774_v29  ;;  %v1729_v29 = vld [vmem:[%s2395_s1 + $0x18] sm:$0xff] }
 0x552   :  { %v755_v28 = vpop.f32.mrf.mxu2 }
 0x553   :  { %v775_v6 = vmul.f32 %v2089_v23, %v755_v28 }
 0x555   :  { %v778_v15 = vadd.f32 %v1626_v14, %v775_v6 }
 0x55a   :  { %v758_v44 = vpop.f32.mrf.mxu2 }
 0x55b   :  { %v779_v10 = vmul.f32 %v2094_v22, %v758_v44 }
 0x55d   :  { %v781_v54 = vadd.f32 %v779_v10, %v777_v12 }
 0x562   :  { %v760_v59 = vpop.f32.mrf.mxu2 }
 0x563   :  { %v780_v5 = vmul.f32 %v2094_v22, %v760_v59  ;;  %v1503_v22 = vld [vmem:[%s2394_s3 + $0x4] sm:$0x3] }
 0x565   :  { %v782_v55 = vadd.f32 %v780_v5, %v778_v15 }
 0x56a   :  { %v763_v3 = vpop.f32.mrf.mxu2 }
 0x56b   :  { %v783_v17 = vmul.f32 %v2105_v34, %v763_v3 }
 0x56d   :  { %v785_v58 = vadd.f32 %v783_v17, %v781_v54  ;;  %v1730_v54 = vld [vmem:[%s2395_s1 + $0x28] sm:$0xff] }
 0x572   :  { %v765_v0 = vpop.f32.mrf.mxu2 }
 0x573   :  { %v784_v19 = vmul.f32 %v2105_v34, %v765_v0 }
 0x575   :  { %v786_v20 = vadd.f32 %v784_v19, %v782_v55 }
 0x57a   :  { %v768_v4 = vpop.f32.mrf.mxu2 }
 0x57b   :  { %v787_v8 = vmul.f32 %v2110_v36, %v768_v4 }
 0x57d   :  { %v789_v23 = vadd.f32 %v787_v8, %v785_v58 }
 0x582   :  { %v770_v16 = vpop.f32.mrf.mxu2 }
 0x583   :  { %v788_v21 = vmul.f32 %v2110_v36, %v770_v16  ;;  %v1731_v16 = vld [vmem:[%s2395_s1 + $0x30] sm:$0xff] }
 0x585   :  { %v790_v18 = vadd.f32 %v788_v21, %v786_v20 }
 0x587   :  { %v791_v24 = vpack.c.bf16 %v790_v18, %v789_v23 }
 0x589   :  { %897 = vmatmul.bf16.vlgmr.msrb.gmra.mxu3 %v791_v24  ;;  %911 = vmatmul.bf16.vlgmr.msra.gmra.mxu1 %v791_v24 }
 0x58a   :  { %926 = vmatpush.bf16.xpose.msrb.mxu0 %v791_v24 }
 0x591   :  { %927 = vmatmul.bf16.vlgmr.msrb.gmra.mxu0 %v1503_v22 }
 0x606   :  { %v912_v34 = vpop.f32.mrf.mxu1 }
 0x607   :  { %947 = vperm.xlu1 %1616, %v912_v34   ;;  %935 = vperm.xlu2 %1615, %v912_v34  }
 0x60c   :  { %v898_v25 = vpop.f32.mrf.mxu3 }
 0x60e   :  { %v914_v26 = vpop.f32.mrf.mxu1  ;;  %v2281_v28 = vpop.f32.mrf.mxu0 }
 0x60f   :  { %1619 = vset.pattern.permute.xlu1 %v1738_v13  ;;  %1617 = vset.pattern.permute.xlu2 %v1738_v13  ;;  %v943_v45 = vperm.slane %v2281_v28, 0  ;;  %v965_v44 = vperm.slane %v2281_v28, 2  ;;  %v976_v5 = vperm.slane %v2281_v28, 3 }
 0x610   :  { %940 = vperm.xlu0 %1608, %v914_v26   ;;  %958 = vperm.xlu2 %1617, %v912_v34  }
 0x611   :  { %962 = vperm.xlu1 %1619, %v914_v26  }
 0x614   :  { %v900_v36 = vpop.f32.mrf.mxu3 }
 0x615   :  { %v932_v30 = vpack.c.bf16 %v900_v36, %v898_v25 }
 0x616   :  { %v930_v31 = vpop.f32.mrf.mxu0 }
 0x617   :  { %1122 = vmatpush.bf16.msra.mxu3 %v932_v30 }
 0x618   :  { %1618 = vset.pattern.permute.xlu0 %v1740_v33 }
 0x619   :  { %951 = vperm.xlu0 %1618, %v914_v26  }
 0x621   :  { %1620 = vset.pattern.permute.xlu0 %v1737_v9  ;;  %v954_v9 = vperm.slane %v2281_v28, 1 }
 0x622   :  { %969 = vperm.xlu0 %1620, %v912_v34   ;;  %v1732_v34 = vld [vmem:[%s2395_s1 + $0x38] sm:$0xff] }
 0x62a   :  { %973 = vperm.xlu0 %1620, %v914_v26  }
 0x661   :  { %v936_v32 = vpop.permute.xlu2 %935 }
 0x662   :  { %v944_v35 = vadd.f32 %v943_v45, %v936_v32 }
 0x664   :  { %vm979_vm1 = vcmp.ge.f32.partialorder %v944_v35, 0.0  ;;  %v987_v13 = vmul.f32 0.2, %v944_v35 }
 0x666   :  { %v995_v37 = vsel %vm979_vm1, %v944_v35, %v987_v13 }
 0x667   :  { %v2291_v40 = vadd.f32 %v1725_v38, %v995_v37 }
 0x669   :  { %v1011_v33 = vsel %vm264_vm2, %v2291_v40, -inf }
 0x66a   :  { %1012 = vmax.xlane.f32.xlu2 %v1011_v33  ;;  %v959_v47 = vpop.permute.xlu2 %958 }
 0x66b   :  { %v966_v50 = vadd.f32 %v965_v44, %v959_v47 }
 0x66d   :  { %v991_v53 = vmul.f32 0.2, %v966_v50  ;;  %vm983_vm5 = vcmp.ge.f32.partialorder %v966_v50, 0.0 }
 0x66f   :  { %v999_v62 = vsel %vm983_vm5, %v966_v50, %v991_v53 }
 0x670   :  { %v1007_v3 = vadd.f32 %v1728_v2, %v999_v62 }
 0x672   :  { %v1023_v6 = vsel %vm264_vm2, %v1007_v3, -inf }
 0x679   :  { %v948_v7 = vpop.permute.xlu1 %947 }
 0x67a   :  { %v955_v41 = vadd.f32 %v954_v9, %v948_v7 }
 0x67c   :  { %vm981_vm3 = vcmp.ge.f32.partialorder %v955_v41, 0.0  ;;  %v989_v42 = vmul.f32 0.2, %v955_v41 }
 0x67e   :  { %v997_v43 = vsel %vm981_vm3, %v955_v41, %v989_v42 }
 0x67f   :  { %v2300_v49 = vadd.f32 %v1726_v46, %v997_v43 }
 0x681   :  { %v1017_v39 = vsel %vm264_vm2, %v2300_v49, -inf }
 0x682   :  { %v941_v48 = vpop.permute.xlu0 %940  ;;  %1018 = vmax.xlane.f32.xlu0 %v1017_v39 }
 0x683   :  { %v945_v51 = vadd.f32 %v943_v45, %v941_v48  ;;  %v963_v59 = vpop.permute.xlu1 %962 }
 0x684   :  { %v967_v63 = vadd.f32 %v965_v44, %v963_v59 }
 0x685   :  { %vm980_vm4 = vcmp.ge.f32.partialorder %v945_v51, 0.0  ;;  %v988_v52 = vmul.f32 0.2, %v945_v51 }
 0x686   :  { %v992_v0 = vmul.f32 0.2, %v967_v63  ;;  %vm984_vm7 = vcmp.ge.f32.partialorder %v967_v63, 0.0 }
 0x687   :  { %v996_v56 = vsel %vm980_vm4, %v945_v51, %v988_v52 }
 0x688   :  { %v1004_v11 = vadd.f32 %v1727_v57, %v996_v56  ;;  %v1000_v15 = vsel %vm984_vm7, %v967_v63, %v992_v0 }
 0x689   :  { %v1008_v55 = vadd.f32 %v1730_v54, %v1000_v15 }
 0x68a   :  { %v1014_v60 = vsel %vm264_vm2, %v1004_v11, -inf }
 0x68b   :  { %1015 = vmax.xlane.f32.xlu1 %v1014_v60  ;;  %v952_v61 = vpop.permute.xlu0 %951  ;;  %v1026_v20 = vsel %vm264_vm2, %v1008_v55, -inf }
 0x68c   :  { %v956_v27 = vadd.f32 %v954_v9, %v952_v61 }
 0x68e   :  { %vm982_vm6 = vcmp.ge.f32.partialorder %v956_v27, 0.0  ;;  %v990_v1 = vmul.f32 0.2, %v956_v27 }
 0x690   :  { %v998_v4 = vsel %vm982_vm6, %v956_v27, %v990_v1 }
 0x691   :  { %v1006_v14 = vadd.f32 %v1729_v29, %v998_v4 }
 0x693   :  { %1024 = vmax.xlane.f32.xlu1 %v1023_v6  ;;  %v1020_v10 = vsel %vm264_vm2, %v1006_v14, -inf }
 0x694   :  { %1021 = vmax.xlane.f32.xlu2 %v1020_v10  ;;  %v970_v12 = vpop.permute.xlu0 %969 }
 0x695   :  { %v977_v17 = vadd.f32 %v976_v5, %v970_v12 }
 0x697   :  { %vm985_vm8 = vcmp.ge.f32.partialorder %v977_v17, 0.0  ;;  %v993_v19 = vmul.f32 0.2, %v977_v17 }
 0x699   :  { %v1001_v8 = vsel %vm985_vm8, %v977_v17, %v993_v19 }
 0x69a   :  { %v1009_v58 = vadd.f32 %v1731_v16, %v1001_v8 }
 0x69c   :  { %1027 = vmax.xlane.f32.xlu2 %v1026_v20  ;;  %v974_v21 = vpop.permute.xlu0 %973  ;;  %v1029_v23 = vsel %vm264_vm2, %v1009_v58, -inf }
 0x69d   :  { %v978_v18 = vadd.f32 %v976_v5, %v974_v21  ;;  %1030 = vmax.xlane.f32.xlu1 %v1029_v23 }
 0x69f   :  { %vm986_vm9 = vcmp.ge.f32.partialorder %v978_v18, 0.0  ;;  %v994_v24 = vmul.f32 0.2, %v978_v18 }
 0x6a1   :  { %v1002_v22 = vsel %vm986_vm9, %v978_v18, %v994_v24 }
 0x6a2   :  { %v1010_v25 = vadd.f32 %v1732_v34, %v1002_v22 }
 0x6a4   :  { %v1032_v26 = vsel %vm264_vm2, %v1010_v25, -inf }
 0x6a5   :  { %1033 = vmax.xlane.f32.xlu2 %v1032_v26 }
 0x6dd   :  { %v1013_v28 = vpop.xlane.xlu2 %1012 }
 0x6de   :  { %v1035_v36 = vsub.f32 %v2291_v40, %v1013_v28 }
 0x6e0   :  { %v1043_v30 = vmul.f32 1.442695, %v1035_v36 }
 0x6e2   :  { %1693 = vpow2.f32 %v1043_v30 }
 0x6e8   :  { %v1694_v31 = vpop.eup %1693 }
 0x6e9   :  { %v1059_v45 = vsel %vm264_vm2, %v1694_v31, 0.0 }
 0x6ea   :  { %1060 = vadd.xlane.f32.xlu1 %v1059_v45 }
 0x6f5   :  { %v1019_v32 = vpop.xlane.xlu0 %1018 }
 0x6f6   :  { %v1037_v35 = vsub.f32 %v2300_v49, %v1019_v32 }
 0x6f8   :  { %v1047_v13 = vmul.f32 1.442695, %v1037_v35 }
 0x6fa   :  { %1695 = vpow2.f32 %v1047_v13 }
 0x6fe   :  { %v1016_v37 = vpop.xlane.xlu1 %1015 }
 0x6ff   :  { %v1036_v38 = vsub.f32 %v1004_v11, %v1016_v37 }
 0x700   :  { %v1696_v33 = vpop.eup %1695 }
 0x701   :  { %v1045_v9 = vmul.f32 1.442695, %v1036_v38  ;;  %v1065_v7 = vsel %vm264_vm2, %v1696_v33, 0.0  ;;  %v1597_v38 = vld [vmem:[%s2397_s6 + $0x38] sm:$0xff] }
 0x702   :  { %1066 = vadd.xlane.f32.xlu1 %v1065_v7  ;;  %1247 = vmatpush.bf16.msrb.mxu1 %v1597_v38  ;;  %v1595_v7 = vld [vmem:[%s2397_s6 + $0x28] sm:$0xff] }
 0x703   :  { %1697 = vpow2.f32 %v1045_v9 }
 0x706   :  { %v1025_v40 = vpop.xlane.xlu1 %1024 }
 0x707   :  { %v1039_v41 = vsub.f32 %v1007_v3, %v1025_v40  ;;  %v1022_v42 = vpop.xlane.xlu2 %1021  ;;  %v1594_v40 = vld [vmem:[%s2397_s6 + $0x20] sm:$0xff] }
 0x708   :  { %v1038_v43 = vsub.f32 %v1006_v14, %v1022_v42  ;;  %v1593_v42 = vld [vmem:[%s2397_s6 + $0x18] sm:$0xff] }
 0x709   :  { %v1698_v44 = vpop.eup %1697  ;;  %v1051_v46 = vmul.f32 1.442695, %v1039_v41 }
 0x70a   :  { %v1049_v47 = vmul.f32 1.442695, %v1038_v43  ;;  %v1062_v39 = vsel %vm264_vm2, %v1698_v44, 0.0  ;;  %v1733_v43 = vld [vmem:[%s2396_s4] ss:$0 sm:$0xff] }
 0x70b   :  { %1699 = vpow2.f32 %v1051_v46  ;;  %1063 = vadd.xlane.f32.xlu2 %v1062_v39  ;;  %v1627_v46 = vld [vmem:[%s2396_s4 + $0x6] ss:$0 sm:$0xff]  ;;  %v1734_v39 = vld [vmem:[%s2396_s4 + $0x1] ss:$0 sm:$0xff] }
 0x70c   :  { %1701 = vpow2.f32 %v1049_v47 }
 0x70f   :  { %v1028_v49 = vpop.xlane.xlu2 %1027 }
 0x710   :  { %v1040_v48 = vsub.f32 %v1008_v55, %v1028_v49  ;;  %v1031_v50 = vpop.xlane.xlu1 %1030 }
 0x711   :  { %v1700_v51 = vpop.eup %1699  ;;  %v1041_v52 = vsub.f32 %v1009_v58, %v1031_v50  ;;  %v1592_v50 = vld [vmem:[%s2397_s6 + $0x10] sm:$0xff] }
 0x712   :  { %v1702_v53 = vpop.eup %1701  ;;  %v1053_v56 = vmul.f32 1.442695, %v1040_v48  ;;  %v1071_v57 = vsel %vm264_vm2, %v1700_v51, 0.0 }
 0x713   :  { %v1055_v11 = vmul.f32 1.442695, %v1041_v52  ;;  %1072 = vadd.xlane.f32.xlu2 %v1071_v57  ;;  %v1068_v59 = vsel %vm264_vm2, %v1702_v53, 0.0 }
 0x714   :  { %1703 = vpow2.f32 %v1053_v56  ;;  %1069 = vadd.xlane.f32.xlu0 %v1068_v59 }
 0x715   :  { %1705 = vpow2.f32 %v1055_v11 }
 0x718   :  { %v1034_v60 = vpop.xlane.xlu2 %1033 }
 0x719   :  { %v1042_v61 = vsub.f32 %v1010_v25, %v1034_v60  ;;  %v1736_v60 = vld [vmem:[%s2396_s4 + $0x3] ss:$0 sm:$0xff] }
 0x71a   :  { %v1704_v62 = vpop.eup %1703 }
 0x71b   :  { %v1706_v63 = vpop.eup %1705  ;;  %v1057_v27 = vmul.f32 1.442695, %v1042_v61  ;;  %v1074_v1 = vsel %vm264_vm2, %v1704_v62, 0.0 }
 0x71c   :  { %1075 = vadd.xlane.f32.xlu1 %v1074_v1  ;;  %v1077_v2 = vsel %vm264_vm2, %v1706_v63, 0.0 }
 0x71d   :  { %1707 = vpow2.f32 %v1057_v27  ;;  %1078 = vadd.xlane.f32.xlu0 %v1077_v2 }
 0x723   :  { %v1708_v3 = vpop.eup %1707 }
 0x724   :  { %v1080_v0 = vsel %vm264_vm2, %v1708_v3, 0.0 }
 0x725   :  { %1081 = vadd.xlane.f32.xlu2 %v1080_v0 }
 0x75d   :  { %v1061_v4 = vpop.xlane.xlu1 %1060 }
 0x75e   :  { %1709 = vrcp.f32 %v1061_v4 }
 0x764   :  { %v1710_v14 = vpop.eup %1709 }
 0x765   :  { %v1091_v10 = vmul.f32 %v1710_v14, %v1694_v31  ;;  %v1590_v14 = vld [vmem:[%s2397_s6] sm:$0xff] }
 0x775   :  { %v1067_v17 = vpop.xlane.xlu1 %1066 }
 0x77e   :  { %v1064_v29 = vpop.xlane.xlu2 %1063 }
 0x77f   :  { %1711 = vrcp.f32 %v1064_v29  ;;  %v1163_v29 = vld [vmem:[%s2398_s5] sm:$0x1] }
 0x785   :  { %v1712_v6 = vpop.eup %1711 }
 0x786   :  { %v1092_v5 = vmul.f32 %v1712_v6, %v1698_v44  ;;  %v1073_v20 = vpop.xlane.xlu2 %1072 }
 0x787   :  { %v1070_v15 = vpop.xlane.xlu0 %1069 }
 0x788   :  { %v1099_v12 = vpack.c.bf16 %v1092_v5, %v1091_v10  ;;  %1713 = vrcp.f32 %v1070_v15 }
 0x789   :  { %1715 = vrcp.f32 %v1067_v17 }
 0x78a   :  { %1504 = vmatmul.msk.bf16.vlgmr.msra.gmra.mxu3 %vm264_vm2, %v1099_v12  ;;  %v1628_v12 = vld [vmem:[%s2396_s4 + $0x7] ss:$0 sm:$0xff] }
 0x78e   :  { %v1714_v19 = vpop.eup %1713 }
 0x78f   :  { %v1716_v54 = vpop.eup %1715  ;;  %v1094_v55 = vmul.f32 %v1714_v19, %v1702_v53  ;;  %v1076_v16 = vpop.xlane.xlu1 %1075  ;;  %v1735_v53 = vld [vmem:[%s2396_s4 + $0x2] ss:$0 sm:$0xff] }
 0x790   :  { %v1093_v8 = vmul.f32 %v1716_v54, %v1696_v33  ;;  %1717 = vrcp.f32 %v1076_v16  ;;  %v1079_v25 = vpop.xlane.xlu0 %1078  ;;  %v1596_v33 = vld [vmem:[%s2397_s6 + $0x30] sm:$0xff] }
 0x791   :  { %1719 = vrcp.f32 %v1073_v20  ;;  %1248 = vmatpush.bf16.msrb.mxu1 %v1596_v33 }
 0x792   :  { %v1100_v58 = vpack.c.bf16 %v1094_v55, %v1093_v8 }
 0x795   :  { %1249 = vmatpush.bf16.msrb.mxu1 %v1595_v7 }
 0x796   :  { %v1718_v21 = vpop.eup %1717 }
 0x797   :  { %v1720_v23 = vpop.eup %1719  ;;  %v1096_v18 = vmul.f32 %v1718_v21, %v1704_v62 }
 0x798   :  { %v1095_v24 = vmul.f32 %v1720_v23, %v1700_v51  ;;  %v1082_v22 = vpop.xlane.xlu2 %1081 }
 0x799   :  { %1721 = vrcp.f32 %v1082_v22  ;;  %1250 = vmatpush.bf16.msrb.mxu1 %v1594_v40 }
 0x79a   :  { %1505 = vmatmul.msk.bf16.gmra.mxu3 %vm264_vm2, %v1100_v58  ;;  %v1101_v34 = vpack.c.bf16 %v1096_v18, %v1095_v24  ;;  %1723 = vrcp.f32 %v1079_v25 }
 0x79d   :  { %1251 = vmatpush.bf16.msrb.mxu1 %v1593_v42 }
 0x79f   :  { %v1722_v26 = vpop.eup %1721 }
 0x7a0   :  { %v1724_v28 = vpop.eup %1723  ;;  %v1098_v36 = vmul.f32 %v1722_v26, %v1708_v3 }
 0x7a1   :  { %v1097_v30 = vmul.f32 %v1724_v28, %v1706_v63  ;;  %1252 = vmatpush.bf16.msrb.mxu1 %v1592_v50  ;;  %v1591_v63 = vld [vmem:[%s2397_s6 + $0x8] sm:$0xff] }
 0x7a3   :  { %v1102_v31 = vpack.c.bf16 %v1098_v36, %v1097_v30 }
 0x7a5   :  { %1253 = vmatpush.bf16.msrb.mxu1 %v1591_v63 }
 0x7a9   :  { %1254 = vmatpush.bf16.msrb.mxu1 %v1590_v14 }
 0x7aa   :  { %1506 = vmatmul.msk.bf16.gmra.mxu3 %vm264_vm2, %v1101_v34 }
 0x7ba   :  { %1507 = vmatmul.msk.bf16.gmra.mxu3 %vm264_vm2, %v1102_v31 }
 0x80d   :  { %v1124_v45 = vpop.f32.mrf.mxu3 }
 0x80e   :  { %v1145_v44 = vmul.f32 %v1733_v43, %v1124_v45 }
 0x810   :  { %v1148_v51 = vadd.f32 %v1627_v46, %v1145_v44 }
 0x815   :  { %v1126_v32 = vpop.f32.mrf.mxu3 }
 0x816   :  { %v1146_v47 = vmul.f32 %v1733_v43, %v1126_v32 }
 0x818   :  { %v1149_v52 = vadd.f32 %v1627_v46, %v1146_v47 }
 0x81d   :  { %v1129_v35 = vpop.f32.mrf.mxu3 }
 0x81e   :  { %v1150_v49 = vmul.f32 %v1734_v39, %v1129_v35 }
 0x820   :  { %v1152_v11 = vadd.f32 %v1150_v49, %v1148_v51 }
 0x825   :  { %v1131_v13 = vpop.f32.mrf.mxu3 }
 0x826   :  { %v1151_v48 = vmul.f32 %v1734_v39, %v1131_v13 }
 0x828   :  { %v1153_v59 = vadd.f32 %v1151_v48, %v1149_v52 }
 0x82d   :  { %v1134_v37 = vpop.f32.mrf.mxu3 }
 0x82e   :  { %v1154_v56 = vmul.f32 %v1735_v53, %v1134_v37 }
 0x830   :  { %v1156_v27 = vadd.f32 %v1154_v56, %v1152_v11 }
 0x835   :  { %v1136_v9 = vpop.f32.mrf.mxu3 }
 0x836   :  { %v1155_v57 = vmul.f32 %v1735_v53, %v1136_v9 }
 0x838   :  { %v1157_v1 = vadd.f32 %v1155_v57, %v1153_v59 }
 0x83d   :  { %v1139_v41 = vpop.f32.mrf.mxu3 }
 0x83e   :  { %v1158_v61 = vmul.f32 %v1736_v60, %v1139_v41 }
 0x840   :  { %v1160_v3 = vadd.f32 %v1158_v61, %v1156_v27 }
 0x845   :  { %v1141_v62 = vpop.f32.mrf.mxu3 }
 0x846   :  { %v1159_v2 = vmul.f32 %v1736_v60, %v1141_v62 }
 0x848   :  { %v1161_v0 = vadd.f32 %v1159_v2, %v1157_v1 }
 0x84a   :  { %v1162_v4 = vpack.c.bf16 %v1161_v0, %v1160_v3 }
 0x84c   :  { %1174 = vmatpush.bf16.msra.mxu0 %v1162_v4 }
 0x84f   :  { %1508 = vmatmul.msk.bf16.vlgmr.msra.gmra.mxu0 %vm264_vm2, %v1163_v29 }
 0x8cc   :  { %v1176_v6 = vpop.f32.mrf.mxu0 }
 0x8cd   :  { %v1180_v10 = vpack.c.bf16 %v1176_v6, %v1176_v6 }
 0x8cf   :  { %1255 = vmatmul.bf16.vlgmr.msrb.gmra.mxu1 %v1180_v10 }
 0x8d4   :  { %v1178_v5 = vpop.f32.mrf.mxu0 }
 0x94c   :  { %v1256_v15 = vpop.f32.mrf.mxu1 }
 0x94d   :  { %v1257_v17 = vadd.f32 %v1628_v12, %v1256_v15 }
 0x94f   :  { %1261 = vst.msk [vmem:[%s2399_s7] sm:$0x3] %vm1260_vm10, %v1257_v17 }
 0x954   :  { %v1258_v19 = vpop.f32.mrf.mxu1 }

</bundles_post_ra>
